<compile_context>
chip_gen: v5e
topology: v5e:2x2
jax: 0.10.0
libtpu: 0.0.40
codegen_flags: <defaults>
</compile_context>

<pallas_src>
import math

import jax
import jax.numpy as jnp
from jax.experimental import pallas as pl
from jax.experimental.pallas import tpu as pltpu

LANE = 128


def _round_up(n, m):
    return ((n + m - 1) // m) * m


# --------------------------------------------------------------------------
# Fused transformer-block kernel (one grid step = one batch element)
# --------------------------------------------------------------------------
def _make_block_kernel(S, E_pad, num_heads, e_real, d_real):
    scale = 1.0 / math.sqrt(d_real)
    inv_e = 1.0 / e_real
    eps = 1e-5

    def _layernorm(x, gamma, beta):
        # Padded lanes of x are exactly zero and gamma/beta are zero-padded,
        # so moments computed with the *real* feature count are exact and the
        # padded lanes stay zero after normalization.
        mu = jnp.sum(x, axis=-1, keepdims=True) * inv_e
        ex2 = jnp.sum(x * x, axis=-1, keepdims=True) * inv_e
        var = ex2 - mu * mu
        return (x - mu) * jax.lax.rsqrt(var + eps) * gamma + beta

    def kernel(x_ref, wq_ref, wk_ref, wv_ref, bq_ref, bk_ref, bv_ref,
               wo_ref, bo_ref, g1_ref, be1_ref,
               w1_ref, b1_ref, w2_ref, b2_ref, g2_ref, be2_ref, o_ref):
        x = x_ref[0]                                   # (S, E_pad) f32
        xb = x.astype(jnp.bfloat16)                    # MXU operands in bf16

        # ---- multi-head self-attention -----------------------------------
        # Heads are selected by indexing the leading (major) axis of the
        # stacked weights -> no lane slicing, no lane concatenation.
        attn = jnp.zeros((S, E_pad), jnp.float32)
        for h in range(num_heads):                     # static unroll (small H)
            q = jnp.dot(xb, wq_ref[h],
                        preferred_element_type=jnp.float32) + bq_ref[h]
            k = jnp.dot(xb, wk_ref[h],
                        preferred_element_type=jnp.float32) + bk_ref[h]
            v = jnp.dot(xb, wv_ref[h],
                        preferred_element_type=jnp.float32) + bv_ref[h]

            s = jax.lax.dot_general(
                q.astype(jnp.bfloat16), k.astype(jnp.bfloat16),
                (((1,), (1,)), ((), ())),
                preferred_element_type=jnp.float32) * scale        # (S, S)
            s = s - jnp.max(s, axis=-1, keepdims=True)
            p = jnp.exp(s)
            p = p * pl.reciprocal(jnp.sum(p, axis=-1, keepdims=True),
                                  approx=True)
            ctx = jnp.dot(p.astype(jnp.bfloat16), v.astype(jnp.bfloat16),
                          preferred_element_type=jnp.float32)       # (S, D_pad)
            # Fold head h's rows of the output projection directly (no concat).
            attn = attn + jnp.dot(ctx.astype(jnp.bfloat16), wo_ref[h],
                                  preferred_element_type=jnp.float32)
        attn = attn + bo_ref[...]

        # ---- residual + LayerNorm 1 ---------------------------------------
        x1 = _layernorm(x + attn, g1_ref[...], be1_ref[...])

        # ---- feed-forward: Linear -> ReLU -> Linear ------------------------
        ff = jnp.dot(x1.astype(jnp.bfloat16), w1_ref[...],
                     preferred_element_type=jnp.float32) + b1_ref[...]
        ff = jnp.maximum(ff, 0.0)
        ff = jnp.dot(ff.astype(jnp.bfloat16), w2_ref[...],
                     preferred_element_type=jnp.float32) + b2_ref[...]

        # ---- residual + LayerNorm 2 ---------------------------------------
        o_ref[0] = _layernorm(x1 + ff, g2_ref[...], be2_ref[...]).astype(o_ref.dtype)

    return kernel


def transformer_block_forward(x, p):
    """x: (B, S, E) float32.  p: padded / stacked params from prepare_params."""
    B, S, E = x.shape
    H, E_pad, D_pad = p["wq"].shape
    F_pad = p["w1"].shape[1]
    D = E // H

    # lane-pad activations once in the wrapper (pad lanes are exact zeros)
    x_p = jnp.zeros((B, S, E_pad), jnp.float32).at[:, :, :E].set(x)

    kernel = _make_block_kernel(S, E_pad, H, E, D)

    full2 = lambda b: (0, 0)
    full3 = lambda b: (0, 0, 0)
    in_specs = [
        pl.BlockSpec((1, S, E_pad), lambda b: (b, 0, 0)),   # x (per-batch tile)
        pl.BlockSpec((H, E_pad, D_pad), full3),             # wq (stacked heads)
        pl.BlockSpec((H, E_pad, D_pad), full3),             # wk
        pl.BlockSpec((H, E_pad, D_pad), full3),             # wv
        pl.BlockSpec((H, 1, D_pad), full3),                 # bq
        pl.BlockSpec((H, 1, D_pad), full3),                 # bk
        pl.BlockSpec((H, 1, D_pad), full3),                 # bv
        pl.BlockSpec((H, D_pad, E_pad), full3),             # wo (stacked heads)
        pl.BlockSpec((1, E_pad), full2),                    # bo
        pl.BlockSpec((1, E_pad), full2),                    # ln1 gamma
        pl.BlockSpec((1, E_pad), full2),                    # ln1 beta
        pl.BlockSpec((E_pad, F_pad), full2),                # ffn w1
        pl.BlockSpec((1, F_pad), full2),                    # ffn b1
        pl.BlockSpec((F_pad, E_pad), full2),                # ffn w2
        pl.BlockSpec((1, E_pad), full2),                    # ffn b2
        pl.BlockSpec((1, E_pad), full2),                    # ln2 gamma
        pl.BlockSpec((1, E_pad), full2),                    # ln2 beta
    ]

    out_p = pl.pallas_call(
        kernel,
        out_shape=jax.ShapeDtypeStruct((B, S, E_pad), jnp.float32),
        grid=(B,),
        in_specs=in_specs,
        out_specs=pl.BlockSpec((1, S, E_pad), lambda b: (b, 0, 0)),
        input_output_aliases={0: 0},                       # reuse x_p's buffer
        compiler_params=pltpu.CompilerParams(
            dimension_semantics=("parallel",),             # megacore on v7x
        ),
    )(x_p, p["wq"], p["wk"], p["wv"], p["bq"], p["bk"], p["bv"],
      p["wo"], p["bo"], p["g1"], p["be1"],
      p["w1"], p["b1"], p["w2"], p["b2"], p["g2"], p["be2"])

    return out_p[:, :, :E]


# --------------------------------------------------------------------------
# Parameter construction (torch-layout raw params -> padded / stacked params)
# --------------------------------------------------------------------------
def init_raw_params(key, embed_dim, ff_dim):
    """Parameters in the same layouts PyTorch uses."""
    E, F = embed_dim, ff_dim
    ks = jax.random.split(key, 12)
    n = lambda k, shape, s=0.1: (s * jax.random.normal(k, shape)).astype(jnp.float32)
    return {
        "in_w":  n(ks[0], (3 * E, E)),     # MultiheadAttention.in_proj_weight
        "in_b":  n(ks[1], (3 * E,)),       # in_proj_bias
        "out_w": n(ks[2], (E, E)),         # out_proj.weight
        "out_b": n(ks[3], (E,)),           # out_proj.bias
        "g1":  1.0 + n(ks[4], (E,)),       # norm1 (non-trivial for testing)
        "be1": n(ks[5], (E,)),
        "w1":  n(ks[6], (F, E)),           # ff[0].weight (out, in)
        "b1":  n(ks[7], (F,)),
        "w2":  n(ks[8], (E, F)),           # ff[2].weight
        "b2":  n(ks[9], (E,)),
        "g2":  1.0 + n(ks[10], (E,)),      # norm2
        "be2": n(ks[11], (E,)),
    }


def prepare_params(raw, num_heads):
    """Transpose to (in, out), zero-pad every dim to 128 lanes, stack per-head
    weights on a leading axis, and pre-cast matmul weights to bf16."""
    E = raw["out_w"].shape[0]
    F = raw["w1"].shape[0]
    H = num_heads
    D = E // H
    E_pad = _round_up(max(E, LANE), LANE)
    F_pad = _round_up(max(F, LANE), LANE)
    D_pad = _round_up(max(D, LANE), LANE)

    def pad2(w, rows, cols, dtype=jnp.float32):
        out = jnp.zeros((rows, cols), dtype)
        return out.at[:w.shape[0], :w.shape[1]].set(w.astype(dtype))

    # transposed (in, out) layouts for x @ W
    wq_t = raw["in_w"][0:E].T
    wk_t = raw["in_w"][E:2 * E].T
    wv_t = raw["in_w"][2 * E:3 * E].T
    wo_t = raw["out_w"].T
    w1_t = raw["w1"].T
    w2_t = raw["w2"].T

    def stack_qkv_w(w_t):                  # (E, E) -> (H, E_pad, D_pad) bf16
        return jnp.stack(
            [pad2(w_t[:, h * D:(h + 1) * D], E_pad, D_pad, jnp.bfloat16)
             for h in range(H)], axis=0)

    def stack_qkv_b(b, off):               # (3E,) -> (H, 1, D_pad) f32
        return jnp.stack(
            [pad2(b[off + h * D: off + (h + 1) * D][None, :], 1, D_pad)
             for h in range(H)], axis=0)

    row = lambda v, n: pad2(v[None, :], 1, n)   # (1, n) f32, zero-padded

    wo = jnp.stack(
        [pad2(wo_t[h * D:(h + 1) * D, :], D_pad, E_pad, jnp.bfloat16)
         for h in range(H)], axis=0)            # (H, D_pad, E_pad)

    return {
        "wq": stack_qkv_w(wq_t), "wk": stack_qkv_w(wk_t), "wv": stack_qkv_w(wv_t),
        "bq": stack_qkv_b(raw["in_b"], 0),
        "bk": stack_qkv_b(raw["in_b"], E),
        "bv": stack_qkv_b(raw["in_b"], 2 * E),
        "wo": wo, "bo": row(raw["out_b"], E_pad),
        "g1": row(raw["g1"], E_pad), "be1": row(raw["be1"], E_pad),
        "w1": pad2(w1_t, E_pad, F_pad, jnp.bfloat16), "b1": row(raw["b1"], F_pad),
        "w2": pad2(w2_t, F_pad, E_pad, jnp.bfloat16), "b2": row(raw["b2"], E_pad),
        "g2": row(raw["g2"], E_pad), "be2": row(raw["be2"], E_pad),
    }


# --------------------------------------------------------------------------
# Pure-JAX reference (mirrors the PyTorch TransformerBlock.forward, f32)
# --------------------------------------------------------------------------
def reference_block(x, raw, num_heads):
    B, S, E = x.shape
    H, D = num_heads, E // num_heads
    qkv = x @ raw["in_w"].T + raw["in_b"]
    q, k, v = jnp.split(qkv, 3, axis=-1)
    split_heads = lambda t: t.reshape(B, S, H, D).transpose(0, 2, 1, 3)
    q, k, v = split_heads(q), split_heads(k), split_heads(v)
    s = jnp.einsum("bhqd,bhkd->bhqk", q, k) / math.sqrt(D)
    p = jax.nn.softmax(s, axis=-1)
    ctx = jnp.einsum("bhqk,bhkd->bhqd", p, v)
    ctx = ctx.transpose(0, 2, 1, 3).reshape(B, S, E)
    attn = ctx @ raw["out_w"].T + raw["out_b"]

    def ln(t, g, b):
        mu = t.mean(-1, keepdims=True)
        var = ((t - mu) ** 2).mean(-1, keepdims=True)
        return (t - mu) / jnp.sqrt(var + 1e-5) * g + b

    x1 = ln(x + attn, raw["g1"], raw["be1"])
    ff = jnp.maximum(x1 @ raw["w1"].T + raw["b1"], 0.0)
    ff = ff @ raw["w2"].T + raw["b2"]
    return ln(x1 + ff, raw["g2"], raw["be2"])


# --------------------------------------------------------------------------
if __name__ == "__main__":
    embed_dim, num_heads, ff_dim = 32, 4, 64
    B, S = 2, 8

    root = jax.random.PRNGKey(0)
    kp, kx = jax.random.split(root)
    raw = init_raw_params(kp, embed_dim, ff_dim)
    x = jax.random.normal(kx, (B, S, embed_dim), dtype=jnp.float32)

    params = prepare_params(raw, num_heads)
    out = transformer_block_forward(x, params)
    jax.block_until_ready(out)

    assert out.shape == (B, S, embed_dim)
    assert bool(jnp.all(jnp.isfinite(out))), "non-finite output"

    # Loose smoke-test tolerance: kernel uses bf16 MXU operands (f32 accumulate),
    # reference is pure f32, so small numeric drift is expected.
    ref = reference_block(x, raw, num_heads)
    err = float(jnp.max(jnp.abs(out - ref)))
    assert err < 2e-1, f"mismatch vs reference: max abs err = {err}"

    print("KERNEL_OK")
</pallas_src>

<mosaic_0001>
module attributes {stable_mosaic.version = 11 : i64} {
  func.func @kernel(%arg0: i32, %arg1: memref<1x8x128xf32, #tpu.memory_space<vmem>>, %arg2: memref<4x128x128xbf16, #tpu.memory_space<vmem>>, %arg3: memref<4x128x128xbf16, #tpu.memory_space<vmem>>, %arg4: memref<4x128x128xbf16, #tpu.memory_space<vmem>>, %arg5: memref<4x1x128xf32, #tpu.memory_space<vmem>>, %arg6: memref<4x1x128xf32, #tpu.memory_space<vmem>>, %arg7: memref<4x1x128xf32, #tpu.memory_space<vmem>>, %arg8: memref<4x128x128xbf16, #tpu.memory_space<vmem>>, %arg9: memref<1x128xf32, #tpu.memory_space<vmem>>, %arg10: memref<1x128xf32, #tpu.memory_space<vmem>>, %arg11: memref<1x128xf32, #tpu.memory_space<vmem>>, %arg12: memref<128x128xbf16, #tpu.memory_space<vmem>>, %arg13: memref<1x128xf32, #tpu.memory_space<vmem>>, %arg14: memref<128x128xbf16, #tpu.memory_space<vmem>>, %arg15: memref<1x128xf32, #tpu.memory_space<vmem>>, %arg16: memref<1x128xf32, #tpu.memory_space<vmem>>, %arg17: memref<1x128xf32, #tpu.memory_space<vmem>>, %arg18: memref<1x8x128xf32, #tpu.memory_space<vmem>>) attributes {dimension_semantics = [#tpu.dimension_semantics<parallel>], iteration_bounds = array<i64: 2>, scalar_prefetch = 0 : i64, scratch_operands = 0 : i64, tpu.core_type = #tpu.core_type<tc>, window_params = [{transform_indices = @transform_0, window_bounds = array<i64: 1, 8, 128>}, {pipeline_mode = #tpu.pipeline_mode<synchronous>, transform_indices = @transform_1, window_bounds = array<i64: 4, 128, 128>}, {pipeline_mode = #tpu.pipeline_mode<synchronous>, transform_indices = @transform_2, window_bounds = array<i64: 4, 128, 128>}, {pipeline_mode = #tpu.pipeline_mode<synchronous>, transform_indices = @transform_3, window_bounds = array<i64: 4, 128, 128>}, {pipeline_mode = #tpu.pipeline_mode<synchronous>, transform_indices = @transform_4, window_bounds = array<i64: 4, 1, 128>}, {pipeline_mode = #tpu.pipeline_mode<synchronous>, transform_indices = @transform_5, window_bounds = array<i64: 4, 1, 128>}, {pipeline_mode = #tpu.pipeline_mode<synchronous>, transform_indices = @transform_6, window_bounds = array<i64: 4, 1, 128>}, {pipeline_mode = #tpu.pipeline_mode<synchronous>, transform_indices = @transform_7, window_bounds = array<i64: 4, 128, 128>}, {pipeline_mode = #tpu.pipeline_mode<synchronous>, transform_indices = @transform_8, window_bounds = array<i64: 1, 128>}, {pipeline_mode = #tpu.pipeline_mode<synchronous>, transform_indices = @transform_9, window_bounds = array<i64: 1, 128>}, {pipeline_mode = #tpu.pipeline_mode<synchronous>, transform_indices = @transform_10, window_bounds = array<i64: 1, 128>}, {pipeline_mode = #tpu.pipeline_mode<synchronous>, transform_indices = @transform_11, window_bounds = array<i64: 128, 128>}, {pipeline_mode = #tpu.pipeline_mode<synchronous>, transform_indices = @transform_12, window_bounds = array<i64: 1, 128>}, {pipeline_mode = #tpu.pipeline_mode<synchronous>, transform_indices = @transform_13, window_bounds = array<i64: 128, 128>}, {pipeline_mode = #tpu.pipeline_mode<synchronous>, transform_indices = @transform_14, window_bounds = array<i64: 1, 128>}, {pipeline_mode = #tpu.pipeline_mode<synchronous>, transform_indices = @transform_15, window_bounds = array<i64: 1, 128>}, {pipeline_mode = #tpu.pipeline_mode<synchronous>, transform_indices = @transform_16, window_bounds = array<i64: 1, 128>}, {transform_indices = @transform_17, window_bounds = array<i64: 1, 8, 128>}]} {
    %c0 = arith.constant 0 : index
    %c0_0 = arith.constant 0 : index
    %c0_1 = arith.constant 0 : index
    %0 = vector.load %arg1[%c0, %c0_0, %c0_1] : memref<1x8x128xf32, #tpu.memory_space<vmem>>, vector<1x8x128xf32>
    %1 = vector.shape_cast %0 : vector<1x8x128xf32> to vector<8x128xf32>
    %2 = arith.truncf %1 : vector<8x128xf32> to vector<8x128xbf16>
    %cst = arith.constant 0.000000e+00 : f32
    %3 = vector.broadcast %cst : f32 to vector<8x128xf32>
    %c0_2 = arith.constant 0 : index
    %c0_3 = arith.constant 0 : index
    %c0_4 = arith.constant 0 : index
    %4 = vector.load %arg2[%c0_2, %c0_3, %c0_4] : memref<4x128x128xbf16, #tpu.memory_space<vmem>>, vector<1x128x128xbf16>
    %5 = vector.shape_cast %4 : vector<1x128x128xbf16> to vector<128x128xbf16>
    %cst_5 = arith.constant dense<0.000000e+00> : vector<8x128xf32>
    %6 = tpu.matmul %2, %5, %cst_5 {dimension_numbers = #tpu.dot_dimension_numbers<[1], [0], [0], [1], [0, 0, 1, 1], [], []>} : vector<8x128xbf16>, vector<128x128xbf16>, vector<8x128xf32> -> vector<8x128xf32>
    %c0_6 = arith.constant 0 : index
    %c0_7 = arith.constant 0 : index
    %c0_8 = arith.constant 0 : index
    %7 = vector.load %arg5[%c0_6, %c0_7, %c0_8] : memref<4x1x128xf32, #tpu.memory_space<vmem>>, vector<1x1x128xf32>
    %8 = vector.shape_cast %7 : vector<1x1x128xf32> to vector<1x128xf32>
    %9 = vector.broadcast %8 : vector<1x128xf32> to vector<8x128xf32>
    %10 = arith.addf %6, %9 : vector<8x128xf32>
    %c0_9 = arith.constant 0 : index
    %c0_10 = arith.constant 0 : index
    %c0_11 = arith.constant 0 : index
    %11 = vector.load %arg3[%c0_9, %c0_10, %c0_11] : memref<4x128x128xbf16, #tpu.memory_space<vmem>>, vector<1x128x128xbf16>
    %12 = vector.shape_cast %11 : vector<1x128x128xbf16> to vector<128x128xbf16>
    %cst_12 = arith.constant dense<0.000000e+00> : vector<8x128xf32>
    %13 = tpu.matmul %2, %12, %cst_12 {dimension_numbers = #tpu.dot_dimension_numbers<[1], [0], [0], [1], [0, 0, 1, 1], [], []>} : vector<8x128xbf16>, vector<128x128xbf16>, vector<8x128xf32> -> vector<8x128xf32>
    %c0_13 = arith.constant 0 : index
    %c0_14 = arith.constant 0 : index
    %c0_15 = arith.constant 0 : index
    %14 = vector.load %arg6[%c0_13, %c0_14, %c0_15] : memref<4x1x128xf32, #tpu.memory_space<vmem>>, vector<1x1x128xf32>
    %15 = vector.shape_cast %14 : vector<1x1x128xf32> to vector<1x128xf32>
    %16 = vector.broadcast %15 : vector<1x128xf32> to vector<8x128xf32>
    %17 = arith.addf %13, %16 : vector<8x128xf32>
    %c0_16 = arith.constant 0 : index
    %c0_17 = arith.constant 0 : index
    %c0_18 = arith.constant 0 : index
    %18 = vector.load %arg4[%c0_16, %c0_17, %c0_18] : memref<4x128x128xbf16, #tpu.memory_space<vmem>>, vector<1x128x128xbf16>
    %19 = vector.shape_cast %18 : vector<1x128x128xbf16> to vector<128x128xbf16>
    %cst_19 = arith.constant dense<0.000000e+00> : vector<8x128xf32>
    %20 = tpu.matmul %2, %19, %cst_19 {dimension_numbers = #tpu.dot_dimension_numbers<[1], [0], [0], [1], [0, 0, 1, 1], [], []>} : vector<8x128xbf16>, vector<128x128xbf16>, vector<8x128xf32> -> vector<8x128xf32>
    %c0_20 = arith.constant 0 : index
    %c0_21 = arith.constant 0 : index
    %c0_22 = arith.constant 0 : index
    %21 = vector.load %arg7[%c0_20, %c0_21, %c0_22] : memref<4x1x128xf32, #tpu.memory_space<vmem>>, vector<1x1x128xf32>
    %22 = vector.shape_cast %21 : vector<1x1x128xf32> to vector<1x128xf32>
    %23 = vector.broadcast %22 : vector<1x128xf32> to vector<8x128xf32>
    %24 = arith.addf %20, %23 : vector<8x128xf32>
    %25 = arith.truncf %10 : vector<8x128xf32> to vector<8x128xbf16>
    %26 = arith.truncf %17 : vector<8x128xf32> to vector<8x128xbf16>
    %cst_23 = arith.constant dense<0.000000e+00> : vector<8x8xf32>
    %27 = tpu.matmul %25, %26, %cst_23 {dimension_numbers = #tpu.dot_dimension_numbers<[1], [1], [0], [0], [0, 0, 1, 0], [], []>} : vector<8x128xbf16>, vector<8x128xbf16>, vector<8x8xf32> -> vector<8x8xf32>
    %cst_24 = arith.constant 0.353553385 : f32
    %28 = vector.broadcast %cst_24 : f32 to vector<8x8xf32>
    %29 = arith.mulf %27, %28 : vector<8x8xf32>
    %cst_25 = arith.constant dense<0xFF800000> : vector<8xf32>
    %30 = vector.multi_reduction <maximumf>, %29, %cst_25 [1] : vector<8x8xf32> to vector<8xf32>
    %31 = vector.shape_cast %30 : vector<8xf32> to vector<8x1xf32>
    %32 = vector.broadcast %31 : vector<8x1xf32> to vector<8x8xf32>
    %33 = arith.subf %29, %32 : vector<8x8xf32>
    %34 = math.exp %33 : vector<8x8xf32>
    %cst_26 = arith.constant dense<0.000000e+00> : vector<8xf32>
    %35 = vector.multi_reduction <add>, %34, %cst_26 [1] : vector<8x8xf32> to vector<8xf32>
    %36 = vector.shape_cast %35 : vector<8xf32> to vector<8x1xf32>
    %37 = tpu.reciprocal %36 {approx = true} : vector<8x1xf32> -> vector<8x1xf32>
    %38 = vector.broadcast %37 : vector<8x1xf32> to vector<8x8xf32>
    %39 = arith.mulf %34, %38 : vector<8x8xf32>
    %40 = arith.truncf %39 : vector<8x8xf32> to vector<8x8xbf16>
    %41 = arith.truncf %24 : vector<8x128xf32> to vector<8x128xbf16>
    %cst_27 = arith.constant dense<0.000000e+00> : vector<8x128xf32>
    %42 = tpu.matmul %40, %41, %cst_27 {dimension_numbers = #tpu.dot_dimension_numbers<[1], [0], [0], [1], [0, 0, 1, 1], [], []>} : vector<8x8xbf16>, vector<8x128xbf16>, vector<8x128xf32> -> vector<8x128xf32>
    %43 = arith.truncf %42 : vector<8x128xf32> to vector<8x128xbf16>
    %c0_28 = arith.constant 0 : index
    %c0_29 = arith.constant 0 : index
    %c0_30 = arith.constant 0 : index
    %44 = vector.load %arg8[%c0_28, %c0_29, %c0_30] : memref<4x128x128xbf16, #tpu.memory_space<vmem>>, vector<1x128x128xbf16>
    %45 = vector.shape_cast %44 : vector<1x128x128xbf16> to vector<128x128xbf16>
    %cst_31 = arith.constant dense<0.000000e+00> : vector<8x128xf32>
    %46 = tpu.matmul %43, %45, %cst_31 {dimension_numbers = #tpu.dot_dimension_numbers<[1], [0], [0], [1], [0, 0, 1, 1], [], []>} : vector<8x128xbf16>, vector<128x128xbf16>, vector<8x128xf32> -> vector<8x128xf32>
    %47 = arith.addf %3, %46 : vector<8x128xf32>
    %c1 = arith.constant 1 : index
    %c0_32 = arith.constant 0 : index
    %c0_33 = arith.constant 0 : index
    %48 = vector.load %arg2[%c1, %c0_32, %c0_33] : memref<4x128x128xbf16, #tpu.memory_space<vmem>>, vector<1x128x128xbf16>
    %49 = vector.shape_cast %48 : vector<1x128x128xbf16> to vector<128x128xbf16>
    %cst_34 = arith.constant dense<0.000000e+00> : vector<8x128xf32>
    %50 = tpu.matmul %2, %49, %cst_34 {dimension_numbers = #tpu.dot_dimension_numbers<[1], [0], [0], [1], [0, 0, 1, 1], [], []>} : vector<8x128xbf16>, vector<128x128xbf16>, vector<8x128xf32> -> vector<8x128xf32>
    %c1_35 = arith.constant 1 : index
    %c0_36 = arith.constant 0 : index
    %c0_37 = arith.constant 0 : index
    %51 = vector.load %arg5[%c1_35, %c0_36, %c0_37] : memref<4x1x128xf32, #tpu.memory_space<vmem>>, vector<1x1x128xf32>
    %52 = vector.shape_cast %51 : vector<1x1x128xf32> to vector<1x128xf32>
    %53 = vector.broadcast %52 : vector<1x128xf32> to vector<8x128xf32>
    %54 = arith.addf %50, %53 : vector<8x128xf32>
    %c1_38 = arith.constant 1 : index
    %c0_39 = arith.constant 0 : index
    %c0_40 = arith.constant 0 : index
    %55 = vector.load %arg3[%c1_38, %c0_39, %c0_40] : memref<4x128x128xbf16, #tpu.memory_space<vmem>>, vector<1x128x128xbf16>
    %56 = vector.shape_cast %55 : vector<1x128x128xbf16> to vector<128x128xbf16>
    %cst_41 = arith.constant dense<0.000000e+00> : vector<8x128xf32>
    %57 = tpu.matmul %2, %56, %cst_41 {dimension_numbers = #tpu.dot_dimension_numbers<[1], [0], [0], [1], [0, 0, 1, 1], [], []>} : vector<8x128xbf16>, vector<128x128xbf16>, vector<8x128xf32> -> vector<8x128xf32>
    %c1_42 = arith.constant 1 : index
    %c0_43 = arith.constant 0 : index
    %c0_44 = arith.constant 0 : index
    %58 = vector.load %arg6[%c1_42, %c0_43, %c0_44] : memref<4x1x128xf32, #tpu.memory_space<vmem>>, vector<1x1x128xf32>
    %59 = vector.shape_cast %58 : vector<1x1x128xf32> to vector<1x128xf32>
    %60 = vector.broadcast %59 : vector<1x128xf32> to vector<8x128xf32>
    %61 = arith.addf %57, %60 : vector<8x128xf32>
    %c1_45 = arith.constant 1 : index
    %c0_46 = arith.constant 0 : index
    %c0_47 = arith.constant 0 : index
    %62 = vector.load %arg4[%c1_45, %c0_46, %c0_47] : memref<4x128x128xbf16, #tpu.memory_space<vmem>>, vector<1x128x128xbf16>
    %63 = vector.shape_cast %62 : vector<1x128x128xbf16> to vector<128x128xbf16>
    %cst_48 = arith.constant dense<0.000000e+00> : vector<8x128xf32>
    %64 = tpu.matmul %2, %63, %cst_48 {dimension_numbers = #tpu.dot_dimension_numbers<[1], [0], [0], [1], [0, 0, 1, 1], [], []>} : vector<8x128xbf16>, vector<128x128xbf16>, vector<8x128xf32> -> vector<8x128xf32>
    %c1_49 = arith.constant 1 : index
    %c0_50 = arith.constant 0 : index
    %c0_51 = arith.constant 0 : index
    %65 = vector.load %arg7[%c1_49, %c0_50, %c0_51] : memref<4x1x128xf32, #tpu.memory_space<vmem>>, vector<1x1x128xf32>
    %66 = vector.shape_cast %65 : vector<1x1x128xf32> to vector<1x128xf32>
    %67 = vector.broadcast %66 : vector<1x128xf32> to vector<8x128xf32>
    %68 = arith.addf %64, %67 : vector<8x128xf32>
    %69 = arith.truncf %54 : vector<8x128xf32> to vector<8x128xbf16>
    %70 = arith.truncf %61 : vector<8x128xf32> to vector<8x128xbf16>
    %cst_52 = arith.constant dense<0.000000e+00> : vector<8x8xf32>
    %71 = tpu.matmul %69, %70, %cst_52 {dimension_numbers = #tpu.dot_dimension_numbers<[1], [1], [0], [0], [0, 0, 1, 0], [], []>} : vector<8x128xbf16>, vector<8x128xbf16>, vector<8x8xf32> -> vector<8x8xf32>
    %cst_53 = arith.constant 0.353553385 : f32
    %72 = vector.broadcast %cst_53 : f32 to vector<8x8xf32>
    %73 = arith.mulf %71, %72 : vector<8x8xf32>
    %cst_54 = arith.constant dense<0xFF800000> : vector<8xf32>
    %74 = vector.multi_reduction <maximumf>, %73, %cst_54 [1] : vector<8x8xf32> to vector<8xf32>
    %75 = vector.shape_cast %74 : vector<8xf32> to vector<8x1xf32>
    %76 = vector.broadcast %75 : vector<8x1xf32> to vector<8x8xf32>
    %77 = arith.subf %73, %76 : vector<8x8xf32>
    %78 = math.exp %77 : vector<8x8xf32>
    %cst_55 = arith.constant dense<0.000000e+00> : vector<8xf32>
    %79 = vector.multi_reduction <add>, %78, %cst_55 [1] : vector<8x8xf32> to vector<8xf32>
    %80 = vector.shape_cast %79 : vector<8xf32> to vector<8x1xf32>
    %81 = tpu.reciprocal %80 {approx = true} : vector<8x1xf32> -> vector<8x1xf32>
    %82 = vector.broadcast %81 : vector<8x1xf32> to vector<8x8xf32>
    %83 = arith.mulf %78, %82 : vector<8x8xf32>
    %84 = arith.truncf %83 : vector<8x8xf32> to vector<8x8xbf16>
    %85 = arith.truncf %68 : vector<8x128xf32> to vector<8x128xbf16>
    %cst_56 = arith.constant dense<0.000000e+00> : vector<8x128xf32>
    %86 = tpu.matmul %84, %85, %cst_56 {dimension_numbers = #tpu.dot_dimension_numbers<[1], [0], [0], [1], [0, 0, 1, 1], [], []>} : vector<8x8xbf16>, vector<8x128xbf16>, vector<8x128xf32> -> vector<8x128xf32>
    %87 = arith.truncf %86 : vector<8x128xf32> to vector<8x128xbf16>
    %c1_57 = arith.constant 1 : index
    %c0_58 = arith.constant 0 : index
    %c0_59 = arith.constant 0 : index
    %88 = vector.load %arg8[%c1_57, %c0_58, %c0_59] : memref<4x128x128xbf16, #tpu.memory_space<vmem>>, vector<1x128x128xbf16>
    %89 = vector.shape_cast %88 : vector<1x128x128xbf16> to vector<128x128xbf16>
    %cst_60 = arith.constant dense<0.000000e+00> : vector<8x128xf32>
    %90 = tpu.matmul %87, %89, %cst_60 {dimension_numbers = #tpu.dot_dimension_numbers<[1], [0], [0], [1], [0, 0, 1, 1], [], []>} : vector<8x128xbf16>, vector<128x128xbf16>, vector<8x128xf32> -> vector<8x128xf32>
    %91 = arith.addf %47, %90 : vector<8x128xf32>
    %c2 = arith.constant 2 : index
    %c0_61 = arith.constant 0 : index
    %c0_62 = arith.constant 0 : index
    %92 = vector.load %arg2[%c2, %c0_61, %c0_62] : memref<4x128x128xbf16, #tpu.memory_space<vmem>>, vector<1x128x128xbf16>
    %93 = vector.shape_cast %92 : vector<1x128x128xbf16> to vector<128x128xbf16>
    %cst_63 = arith.constant dense<0.000000e+00> : vector<8x128xf32>
    %94 = tpu.matmul %2, %93, %cst_63 {dimension_numbers = #tpu.dot_dimension_numbers<[1], [0], [0], [1], [0, 0, 1, 1], [], []>} : vector<8x128xbf16>, vector<128x128xbf16>, vector<8x128xf32> -> vector<8x128xf32>
    %c2_64 = arith.constant 2 : index
    %c0_65 = arith.constant 0 : index
    %c0_66 = arith.constant 0 : index
    %95 = vector.load %arg5[%c2_64, %c0_65, %c0_66] : memref<4x1x128xf32, #tpu.memory_space<vmem>>, vector<1x1x128xf32>
    %96 = vector.shape_cast %95 : vector<1x1x128xf32> to vector<1x128xf32>
    %97 = vector.broadcast %96 : vector<1x128xf32> to vector<8x128xf32>
    %98 = arith.addf %94, %97 : vector<8x128xf32>
    %c2_67 = arith.constant 2 : index
    %c0_68 = arith.constant 0 : index
    %c0_69 = arith.constant 0 : index
    %99 = vector.load %arg3[%c2_67, %c0_68, %c0_69] : memref<4x128x128xbf16, #tpu.memory_space<vmem>>, vector<1x128x128xbf16>
    %100 = vector.shape_cast %99 : vector<1x128x128xbf16> to vector<128x128xbf16>
    %cst_70 = arith.constant dense<0.000000e+00> : vector<8x128xf32>
    %101 = tpu.matmul %2, %100, %cst_70 {dimension_numbers = #tpu.dot_dimension_numbers<[1], [0], [0], [1], [0, 0, 1, 1], [], []>} : vector<8x128xbf16>, vector<128x128xbf16>, vector<8x128xf32> -> vector<8x128xf32>
    %c2_71 = arith.constant 2 : index
    %c0_72 = arith.constant 0 : index
    %c0_73 = arith.constant 0 : index
    %102 = vector.load %arg6[%c2_71, %c0_72, %c0_73] : memref<4x1x128xf32, #tpu.memory_space<vmem>>, vector<1x1x128xf32>
    %103 = vector.shape_cast %102 : vector<1x1x128xf32> to vector<1x128xf32>
    %104 = vector.broadcast %103 : vector<1x128xf32> to vector<8x128xf32>
    %105 = arith.addf %101, %104 : vector<8x128xf32>
    %c2_74 = arith.constant 2 : index
    %c0_75 = arith.constant 0 : index
    %c0_76 = arith.constant 0 : index
    %106 = vector.load %arg4[%c2_74, %c0_75, %c0_76] : memref<4x128x128xbf16, #tpu.memory_space<vmem>>, vector<1x128x128xbf16>
    %107 = vector.shape_cast %106 : vector<1x128x128xbf16> to vector<128x128xbf16>
    %cst_77 = arith.constant dense<0.000000e+00> : vector<8x128xf32>
    %108 = tpu.matmul %2, %107, %cst_77 {dimension_numbers = #tpu.dot_dimension_numbers<[1], [0], [0], [1], [0, 0, 1, 1], [], []>} : vector<8x128xbf16>, vector<128x128xbf16>, vector<8x128xf32> -> vector<8x128xf32>
    %c2_78 = arith.constant 2 : index
    %c0_79 = arith.constant 0 : index
    %c0_80 = arith.constant 0 : index
    %109 = vector.load %arg7[%c2_78, %c0_79, %c0_80] : memref<4x1x128xf32, #tpu.memory_space<vmem>>, vector<1x1x128xf32>
    %110 = vector.shape_cast %109 : vector<1x1x128xf32> to vector<1x128xf32>
    %111 = vector.broadcast %110 : vector<1x128xf32> to vector<8x128xf32>
    %112 = arith.addf %108, %111 : vector<8x128xf32>
    %113 = arith.truncf %98 : vector<8x128xf32> to vector<8x128xbf16>
    %114 = arith.truncf %105 : vector<8x128xf32> to vector<8x128xbf16>
    %cst_81 = arith.constant dense<0.000000e+00> : vector<8x8xf32>
    %115 = tpu.matmul %113, %114, %cst_81 {dimension_numbers = #tpu.dot_dimension_numbers<[1], [1], [0], [0], [0, 0, 1, 0], [], []>} : vector<8x128xbf16>, vector<8x128xbf16>, vector<8x8xf32> -> vector<8x8xf32>
    %cst_82 = arith.constant 0.353553385 : f32
    %116 = vector.broadcast %cst_82 : f32 to vector<8x8xf32>
    %117 = arith.mulf %115, %116 : vector<8x8xf32>
    %cst_83 = arith.constant dense<0xFF800000> : vector<8xf32>
    %118 = vector.multi_reduction <maximumf>, %117, %cst_83 [1] : vector<8x8xf32> to vector<8xf32>
    %119 = vector.shape_cast %118 : vector<8xf32> to vector<8x1xf32>
    %120 = vector.broadcast %119 : vector<8x1xf32> to vector<8x8xf32>
    %121 = arith.subf %117, %120 : vector<8x8xf32>
    %122 = math.exp %121 : vector<8x8xf32>
    %cst_84 = arith.constant dense<0.000000e+00> : vector<8xf32>
    %123 = vector.multi_reduction <add>, %122, %cst_84 [1] : vector<8x8xf32> to vector<8xf32>
    %124 = vector.shape_cast %123 : vector<8xf32> to vector<8x1xf32>
    %125 = tpu.reciprocal %124 {approx = true} : vector<8x1xf32> -> vector<8x1xf32>
    %126 = vector.broadcast %125 : vector<8x1xf32> to vector<8x8xf32>
    %127 = arith.mulf %122, %126 : vector<8x8xf32>
    %128 = arith.truncf %127 : vector<8x8xf32> to vector<8x8xbf16>
    %129 = arith.truncf %112 : vector<8x128xf32> to vector<8x128xbf16>
    %cst_85 = arith.constant dense<0.000000e+00> : vector<8x128xf32>
    %130 = tpu.matmul %128, %129, %cst_85 {dimension_numbers = #tpu.dot_dimension_numbers<[1], [0], [0], [1], [0, 0, 1, 1], [], []>} : vector<8x8xbf16>, vector<8x128xbf16>, vector<8x128xf32> -> vector<8x128xf32>
    %131 = arith.truncf %130 : vector<8x128xf32> to vector<8x128xbf16>
    %c2_86 = arith.constant 2 : index
    %c0_87 = arith.constant 0 : index
    %c0_88 = arith.constant 0 : index
    %132 = vector.load %arg8[%c2_86, %c0_87, %c0_88] : memref<4x128x128xbf16, #tpu.memory_space<vmem>>, vector<1x128x128xbf16>
    %133 = vector.shape_cast %132 : vector<1x128x128xbf16> to vector<128x128xbf16>
    %cst_89 = arith.constant dense<0.000000e+00> : vector<8x128xf32>
    %134 = tpu.matmul %131, %133, %cst_89 {dimension_numbers = #tpu.dot_dimension_numbers<[1], [0], [0], [1], [0, 0, 1, 1], [], []>} : vector<8x128xbf16>, vector<128x128xbf16>, vector<8x128xf32> -> vector<8x128xf32>
    %135 = arith.addf %91, %134 : vector<8x128xf32>
    %c3 = arith.constant 3 : index
    %c0_90 = arith.constant 0 : index
    %c0_91 = arith.constant 0 : index
    %136 = vector.load %arg2[%c3, %c0_90, %c0_91] : memref<4x128x128xbf16, #tpu.memory_space<vmem>>, vector<1x128x128xbf16>
    %137 = vector.shape_cast %136 : vector<1x128x128xbf16> to vector<128x128xbf16>
    %cst_92 = arith.constant dense<0.000000e+00> : vector<8x128xf32>
    %138 = tpu.matmul %2, %137, %cst_92 {dimension_numbers = #tpu.dot_dimension_numbers<[1], [0], [0], [1], [0, 0, 1, 1], [], []>} : vector<8x128xbf16>, vector<128x128xbf16>, vector<8x128xf32> -> vector<8x128xf32>
    %c3_93 = arith.constant 3 : index
    %c0_94 = arith.constant 0 : index
    %c0_95 = arith.constant 0 : index
    %139 = vector.load %arg5[%c3_93, %c0_94, %c0_95] : memref<4x1x128xf32, #tpu.memory_space<vmem>>, vector<1x1x128xf32>
    %140 = vector.shape_cast %139 : vector<1x1x128xf32> to vector<1x128xf32>
    %141 = vector.broadcast %140 : vector<1x128xf32> to vector<8x128xf32>
    %142 = arith.addf %138, %141 : vector<8x128xf32>
    %c3_96 = arith.constant 3 : index
    %c0_97 = arith.constant 0 : index
    %c0_98 = arith.constant 0 : index
    %143 = vector.load %arg3[%c3_96, %c0_97, %c0_98] : memref<4x128x128xbf16, #tpu.memory_space<vmem>>, vector<1x128x128xbf16>
    %144 = vector.shape_cast %143 : vector<1x128x128xbf16> to vector<128x128xbf16>
    %cst_99 = arith.constant dense<0.000000e+00> : vector<8x128xf32>
    %145 = tpu.matmul %2, %144, %cst_99 {dimension_numbers = #tpu.dot_dimension_numbers<[1], [0], [0], [1], [0, 0, 1, 1], [], []>} : vector<8x128xbf16>, vector<128x128xbf16>, vector<8x128xf32> -> vector<8x128xf32>
    %c3_100 = arith.constant 3 : index
    %c0_101 = arith.constant 0 : index
    %c0_102 = arith.constant 0 : index
    %146 = vector.load %arg6[%c3_100, %c0_101, %c0_102] : memref<4x1x128xf32, #tpu.memory_space<vmem>>, vector<1x1x128xf32>
    %147 = vector.shape_cast %146 : vector<1x1x128xf32> to vector<1x128xf32>
    %148 = vector.broadcast %147 : vector<1x128xf32> to vector<8x128xf32>
    %149 = arith.addf %145, %148 : vector<8x128xf32>
    %c3_103 = arith.constant 3 : index
    %c0_104 = arith.constant 0 : index
    %c0_105 = arith.constant 0 : index
    %150 = vector.load %arg4[%c3_103, %c0_104, %c0_105] : memref<4x128x128xbf16, #tpu.memory_space<vmem>>, vector<1x128x128xbf16>
    %151 = vector.shape_cast %150 : vector<1x128x128xbf16> to vector<128x128xbf16>
    %cst_106 = arith.constant dense<0.000000e+00> : vector<8x128xf32>
    %152 = tpu.matmul %2, %151, %cst_106 {dimension_numbers = #tpu.dot_dimension_numbers<[1], [0], [0], [1], [0, 0, 1, 1], [], []>} : vector<8x128xbf16>, vector<128x128xbf16>, vector<8x128xf32> -> vector<8x128xf32>
    %c3_107 = arith.constant 3 : index
    %c0_108 = arith.constant 0 : index
    %c0_109 = arith.constant 0 : index
    %153 = vector.load %arg7[%c3_107, %c0_108, %c0_109] : memref<4x1x128xf32, #tpu.memory_space<vmem>>, vector<1x1x128xf32>
    %154 = vector.shape_cast %153 : vector<1x1x128xf32> to vector<1x128xf32>
    %155 = vector.broadcast %154 : vector<1x128xf32> to vector<8x128xf32>
    %156 = arith.addf %152, %155 : vector<8x128xf32>
    %157 = arith.truncf %142 : vector<8x128xf32> to vector<8x128xbf16>
    %158 = arith.truncf %149 : vector<8x128xf32> to vector<8x128xbf16>
    %cst_110 = arith.constant dense<0.000000e+00> : vector<8x8xf32>
    %159 = tpu.matmul %157, %158, %cst_110 {dimension_numbers = #tpu.dot_dimension_numbers<[1], [1], [0], [0], [0, 0, 1, 0], [], []>} : vector<8x128xbf16>, vector<8x128xbf16>, vector<8x8xf32> -> vector<8x8xf32>
    %cst_111 = arith.constant 0.353553385 : f32
    %160 = vector.broadcast %cst_111 : f32 to vector<8x8xf32>
    %161 = arith.mulf %159, %160 : vector<8x8xf32>
    %cst_112 = arith.constant dense<0xFF800000> : vector<8xf32>
    %162 = vector.multi_reduction <maximumf>, %161, %cst_112 [1] : vector<8x8xf32> to vector<8xf32>
    %163 = vector.shape_cast %162 : vector<8xf32> to vector<8x1xf32>
    %164 = vector.broadcast %163 : vector<8x1xf32> to vector<8x8xf32>
    %165 = arith.subf %161, %164 : vector<8x8xf32>
    %166 = math.exp %165 : vector<8x8xf32>
    %cst_113 = arith.constant dense<0.000000e+00> : vector<8xf32>
    %167 = vector.multi_reduction <add>, %166, %cst_113 [1] : vector<8x8xf32> to vector<8xf32>
    %168 = vector.shape_cast %167 : vector<8xf32> to vector<8x1xf32>
    %169 = tpu.reciprocal %168 {approx = true} : vector<8x1xf32> -> vector<8x1xf32>
    %170 = vector.broadcast %169 : vector<8x1xf32> to vector<8x8xf32>
    %171 = arith.mulf %166, %170 : vector<8x8xf32>
    %172 = arith.truncf %171 : vector<8x8xf32> to vector<8x8xbf16>
    %173 = arith.truncf %156 : vector<8x128xf32> to vector<8x128xbf16>
    %cst_114 = arith.constant dense<0.000000e+00> : vector<8x128xf32>
    %174 = tpu.matmul %172, %173, %cst_114 {dimension_numbers = #tpu.dot_dimension_numbers<[1], [0], [0], [1], [0, 0, 1, 1], [], []>} : vector<8x8xbf16>, vector<8x128xbf16>, vector<8x128xf32> -> vector<8x128xf32>
    %175 = arith.truncf %174 : vector<8x128xf32> to vector<8x128xbf16>
    %c3_115 = arith.constant 3 : index
    %c0_116 = arith.constant 0 : index
    %c0_117 = arith.constant 0 : index
    %176 = vector.load %arg8[%c3_115, %c0_116, %c0_117] : memref<4x128x128xbf16, #tpu.memory_space<vmem>>, vector<1x128x128xbf16>
    %177 = vector.shape_cast %176 : vector<1x128x128xbf16> to vector<128x128xbf16>
    %cst_118 = arith.constant dense<0.000000e+00> : vector<8x128xf32>
    %178 = tpu.matmul %175, %177, %cst_118 {dimension_numbers = #tpu.dot_dimension_numbers<[1], [0], [0], [1], [0, 0, 1, 1], [], []>} : vector<8x128xbf16>, vector<128x128xbf16>, vector<8x128xf32> -> vector<8x128xf32>
    %179 = arith.addf %135, %178 : vector<8x128xf32>
    %c0_119 = arith.constant 0 : index
    %c0_120 = arith.constant 0 : index
    %180 = vector.load %arg9[%c0_119, %c0_120] : memref<1x128xf32, #tpu.memory_space<vmem>>, vector<1x128xf32>
    %181 = vector.broadcast %180 : vector<1x128xf32> to vector<8x128xf32>
    %182 = arith.addf %179, %181 : vector<8x128xf32>
    %183 = arith.addf %1, %182 : vector<8x128xf32>
    %c0_121 = arith.constant 0 : index
    %c0_122 = arith.constant 0 : index
    %184 = vector.load %arg10[%c0_121, %c0_122] : memref<1x128xf32, #tpu.memory_space<vmem>>, vector<1x128xf32>
    %c0_123 = arith.constant 0 : index
    %c0_124 = arith.constant 0 : index
    %185 = vector.load %arg11[%c0_123, %c0_124] : memref<1x128xf32, #tpu.memory_space<vmem>>, vector<1x128xf32>
    %cst_125 = arith.constant dense<0.000000e+00> : vector<8xf32>
    %186 = vector.multi_reduction <add>, %183, %cst_125 [1] : vector<8x128xf32> to vector<8xf32>
    %187 = vector.shape_cast %186 : vector<8xf32> to vector<8x1xf32>
    %cst_126 = arith.constant 3.125000e-02 : f32
    %188 = vector.broadcast %cst_126 : f32 to vector<8x1xf32>
    %189 = arith.mulf %187, %188 : vector<8x1xf32>
    %190 = arith.mulf %183, %183 : vector<8x128xf32>
    %cst_127 = arith.constant dense<0.000000e+00> : vector<8xf32>
    %191 = vector.multi_reduction <add>, %190, %cst_127 [1] : vector<8x128xf32> to vector<8xf32>
    %192 = vector.shape_cast %191 : vector<8xf32> to vector<8x1xf32>
    %cst_128 = arith.constant 3.125000e-02 : f32
    %193 = vector.broadcast %cst_128 : f32 to vector<8x1xf32>
    %194 = arith.mulf %192, %193 : vector<8x1xf32>
    %195 = arith.mulf %189, %189 : vector<8x1xf32>
    %196 = arith.subf %194, %195 : vector<8x1xf32>
    %197 = vector.broadcast %189 : vector<8x1xf32> to vector<8x128xf32>
    %198 = arith.subf %183, %197 : vector<8x128xf32>
    %cst_129 = arith.constant 9.99999974E-6 : f32
    %199 = vector.broadcast %cst_129 : f32 to vector<8x1xf32>
    %200 = arith.addf %196, %199 : vector<8x1xf32>
    %201 = math.rsqrt %200 : vector<8x1xf32>
    %202 = vector.broadcast %201 : vector<8x1xf32> to vector<8x128xf32>
    %203 = arith.mulf %198, %202 : vector<8x128xf32>
    %204 = vector.broadcast %184 : vector<1x128xf32> to vector<8x128xf32>
    %205 = arith.mulf %203, %204 : vector<8x128xf32>
    %206 = vector.broadcast %185 : vector<1x128xf32> to vector<8x128xf32>
    %207 = arith.addf %205, %206 : vector<8x128xf32>
    %208 = arith.truncf %207 : vector<8x128xf32> to vector<8x128xbf16>
    %c0_130 = arith.constant 0 : index
    %c0_131 = arith.constant 0 : index
    %209 = vector.load %arg12[%c0_130, %c0_131] : memref<128x128xbf16, #tpu.memory_space<vmem>>, vector<128x128xbf16>
    %cst_132 = arith.constant dense<0.000000e+00> : vector<8x128xf32>
    %210 = tpu.matmul %208, %209, %cst_132 {dimension_numbers = #tpu.dot_dimension_numbers<[1], [0], [0], [1], [0, 0, 1, 1], [], []>} : vector<8x128xbf16>, vector<128x128xbf16>, vector<8x128xf32> -> vector<8x128xf32>
    %c0_133 = arith.constant 0 : index
    %c0_134 = arith.constant 0 : index
    %211 = vector.load %arg13[%c0_133, %c0_134] : memref<1x128xf32, #tpu.memory_space<vmem>>, vector<1x128xf32>
    %212 = vector.broadcast %211 : vector<1x128xf32> to vector<8x128xf32>
    %213 = arith.addf %210, %212 : vector<8x128xf32>
    %cst_135 = arith.constant 0.000000e+00 : f32
    %214 = vector.broadcast %cst_135 : f32 to vector<8x128xf32>
    %215 = arith.maximumf %213, %214 : vector<8x128xf32>
    %216 = arith.truncf %215 : vector<8x128xf32> to vector<8x128xbf16>
    %c0_136 = arith.constant 0 : index
    %c0_137 = arith.constant 0 : index
    %217 = vector.load %arg14[%c0_136, %c0_137] : memref<128x128xbf16, #tpu.memory_space<vmem>>, vector<128x128xbf16>
    %cst_138 = arith.constant dense<0.000000e+00> : vector<8x128xf32>
    %218 = tpu.matmul %216, %217, %cst_138 {dimension_numbers = #tpu.dot_dimension_numbers<[1], [0], [0], [1], [0, 0, 1, 1], [], []>} : vector<8x128xbf16>, vector<128x128xbf16>, vector<8x128xf32> -> vector<8x128xf32>
    %c0_139 = arith.constant 0 : index
    %c0_140 = arith.constant 0 : index
    %219 = vector.load %arg15[%c0_139, %c0_140] : memref<1x128xf32, #tpu.memory_space<vmem>>, vector<1x128xf32>
    %220 = vector.broadcast %219 : vector<1x128xf32> to vector<8x128xf32>
    %221 = arith.addf %218, %220 : vector<8x128xf32>
    %222 = arith.addf %207, %221 : vector<8x128xf32>
    %c0_141 = arith.constant 0 : index
    %c0_142 = arith.constant 0 : index
    %223 = vector.load %arg16[%c0_141, %c0_142] : memref<1x128xf32, #tpu.memory_space<vmem>>, vector<1x128xf32>
    %c0_143 = arith.constant 0 : index
    %c0_144 = arith.constant 0 : index
    %224 = vector.load %arg17[%c0_143, %c0_144] : memref<1x128xf32, #tpu.memory_space<vmem>>, vector<1x128xf32>
    %cst_145 = arith.constant dense<0.000000e+00> : vector<8xf32>
    %225 = vector.multi_reduction <add>, %222, %cst_145 [1] : vector<8x128xf32> to vector<8xf32>
    %226 = vector.shape_cast %225 : vector<8xf32> to vector<8x1xf32>
    %cst_146 = arith.constant 3.125000e-02 : f32
    %227 = vector.broadcast %cst_146 : f32 to vector<8x1xf32>
    %228 = arith.mulf %226, %227 : vector<8x1xf32>
    %229 = arith.mulf %222, %222 : vector<8x128xf32>
    %cst_147 = arith.constant dense<0.000000e+00> : vector<8xf32>
    %230 = vector.multi_reduction <add>, %229, %cst_147 [1] : vector<8x128xf32> to vector<8xf32>
    %231 = vector.shape_cast %230 : vector<8xf32> to vector<8x1xf32>
    %cst_148 = arith.constant 3.125000e-02 : f32
    %232 = vector.broadcast %cst_148 : f32 to vector<8x1xf32>
    %233 = arith.mulf %231, %232 : vector<8x1xf32>
    %234 = arith.mulf %228, %228 : vector<8x1xf32>
    %235 = arith.subf %233, %234 : vector<8x1xf32>
    %236 = vector.broadcast %228 : vector<8x1xf32> to vector<8x128xf32>
    %237 = arith.subf %222, %236 : vector<8x128xf32>
    %cst_149 = arith.constant 9.99999974E-6 : f32
    %238 = vector.broadcast %cst_149 : f32 to vector<8x1xf32>
    %239 = arith.addf %235, %238 : vector<8x1xf32>
    %240 = math.rsqrt %239 : vector<8x1xf32>
    %241 = vector.broadcast %240 : vector<8x1xf32> to vector<8x128xf32>
    %242 = arith.mulf %237, %241 : vector<8x128xf32>
    %243 = vector.broadcast %223 : vector<1x128xf32> to vector<8x128xf32>
    %244 = arith.mulf %242, %243 : vector<8x128xf32>
    %245 = vector.broadcast %224 : vector<1x128xf32> to vector<8x128xf32>
    %246 = arith.addf %244, %245 : vector<8x128xf32>
    %c0_150 = arith.constant 0 : index
    %c0_151 = arith.constant 0 : index
    %c0_152 = arith.constant 0 : index
    %247 = vector.load %arg18[%c0_150, %c0_151, %c0_152] : memref<1x8x128xf32, #tpu.memory_space<vmem>>, vector<1x8x128xf32>
    %248 = vector.shape_cast %247 : vector<1x8x128xf32> to vector<8x128xf32>
    %249 = vector.shape_cast %246 : vector<8x128xf32> to vector<1x8x128xf32>
    tpu.vector_store %arg18[%c0_150, %c0_151, %c0_152], %249 {strides = array<i32>} : memref<1x8x128xf32, #tpu.memory_space<vmem>>, vector<1x8x128xf32>,
    return
  }
  func.func @transform_0(%arg0: i32) -> (i32, i32, i32) {
    %c0_i32 = arith.constant 0 : i32
    %c0_i32_0 = arith.constant 0 : i32
    %c0_i32_1 = arith.constant 0 : i32
    return %arg0, %c0_i32, %c0_i32_0 : i32, i32, i32
  }
  func.func @transform_1(%arg0: i32) -> (i32, i32, i32) {
    %c0_i32 = arith.constant 0 : i32
    %c0_i32_0 = arith.constant 0 : i32
    %c0_i32_1 = arith.constant 0 : i32
    %c0_i32_2 = arith.constant 0 : i32
    return %c0_i32, %c0_i32_0, %c0_i32_1 : i32, i32, i32
  }
  func.func @transform_2(%arg0: i32) -> (i32, i32, i32) {
    %c0_i32 = arith.constant 0 : i32
    %c0_i32_0 = arith.constant 0 : i32
    %c0_i32_1 = arith.constant 0 : i32
    %c0_i32_2 = arith.constant 0 : i32
    return %c0_i32, %c0_i32_0, %c0_i32_1 : i32, i32, i32
  }
  func.func @transform_3(%arg0: i32) -> (i32, i32, i32) {
    %c0_i32 = arith.constant 0 : i32
    %c0_i32_0 = arith.constant 0 : i32
    %c0_i32_1 = arith.constant 0 : i32
    %c0_i32_2 = arith.constant 0 : i32
    return %c0_i32, %c0_i32_0, %c0_i32_1 : i32, i32, i32
  }
  func.func @transform_4(%arg0: i32) -> (i32, i32, i32) {
    %c0_i32 = arith.constant 0 : i32
    %c0_i32_0 = arith.constant 0 : i32
    %c0_i32_1 = arith.constant 0 : i32
    %c0_i32_2 = arith.constant 0 : i32
    return %c0_i32, %c0_i32_0, %c0_i32_1 : i32, i32, i32
  }
  func.func @transform_5(%arg0: i32) -> (i32, i32, i32) {
    %c0_i32 = arith.constant 0 : i32
    %c0_i32_0 = arith.constant 0 : i32
    %c0_i32_1 = arith.constant 0 : i32
    %c0_i32_2 = arith.constant 0 : i32
    return %c0_i32, %c0_i32_0, %c0_i32_1 : i32, i32, i32
  }
  func.func @transform_6(%arg0: i32) -> (i32, i32, i32) {
    %c0_i32 = arith.constant 0 : i32
    %c0_i32_0 = arith.constant 0 : i32
    %c0_i32_1 = arith.constant 0 : i32
    %c0_i32_2 = arith.constant 0 : i32
    return %c0_i32, %c0_i32_0, %c0_i32_1 : i32, i32, i32
  }
  func.func @transform_7(%arg0: i32) -> (i32, i32, i32) {
    %c0_i32 = arith.constant 0 : i32
    %c0_i32_0 = arith.constant 0 : i32
    %c0_i32_1 = arith.constant 0 : i32
    %c0_i32_2 = arith.constant 0 : i32
    return %c0_i32, %c0_i32_0, %c0_i32_1 : i32, i32, i32
  }
  func.func @transform_8(%arg0: i32) -> (i32, i32) {
    %c0_i32 = arith.constant 0 : i32
    %c0_i32_0 = arith.constant 0 : i32
    %c0_i32_1 = arith.constant 0 : i32
    return %c0_i32, %c0_i32_0 : i32, i32
  }
  func.func @transform_9(%arg0: i32) -> (i32, i32) {
    %c0_i32 = arith.constant 0 : i32
    %c0_i32_0 = arith.constant 0 : i32
    %c0_i32_1 = arith.constant 0 : i32
    return %c0_i32, %c0_i32_0 : i32, i32
  }
  func.func @transform_10(%arg0: i32) -> (i32, i32) {
    %c0_i32 = arith.constant 0 : i32
    %c0_i32_0 = arith.constant 0 : i32
    %c0_i32_1 = arith.constant 0 : i32
    return %c0_i32, %c0_i32_0 : i32, i32
  }
  func.func @transform_11(%arg0: i32) -> (i32, i32) {
    %c0_i32 = arith.constant 0 : i32
    %c0_i32_0 = arith.constant 0 : i32
    %c0_i32_1 = arith.constant 0 : i32
    return %c0_i32, %c0_i32_0 : i32, i32
  }
  func.func @transform_12(%arg0: i32) -> (i32, i32) {
    %c0_i32 = arith.constant 0 : i32
    %c0_i32_0 = arith.constant 0 : i32
    %c0_i32_1 = arith.constant 0 : i32
    return %c0_i32, %c0_i32_0 : i32, i32
  }
  func.func @transform_13(%arg0: i32) -> (i32, i32) {
    %c0_i32 = arith.constant 0 : i32
    %c0_i32_0 = arith.constant 0 : i32
    %c0_i32_1 = arith.constant 0 : i32
    return %c0_i32, %c0_i32_0 : i32, i32
  }
  func.func @transform_14(%arg0: i32) -> (i32, i32) {
    %c0_i32 = arith.constant 0 : i32
    %c0_i32_0 = arith.constant 0 : i32
    %c0_i32_1 = arith.constant 0 : i32
    return %c0_i32, %c0_i32_0 : i32, i32
  }
  func.func @transform_15(%arg0: i32) -> (i32, i32) {
    %c0_i32 = arith.constant 0 : i32
    %c0_i32_0 = arith.constant 0 : i32
    %c0_i32_1 = arith.constant 0 : i32
    return %c0_i32, %c0_i32_0 : i32, i32
  }
  func.func @transform_16(%arg0: i32) -> (i32, i32) {
    %c0_i32 = arith.constant 0 : i32
    %c0_i32_0 = arith.constant 0 : i32
    %c0_i32_1 = arith.constant 0 : i32
    return %c0_i32, %c0_i32_0 : i32, i32
  }
  func.func @transform_17(%arg0: i32) -> (i32, i32, i32) {
    %c0_i32 = arith.constant 0 : i32
    %c0_i32_0 = arith.constant 0 : i32
    %c0_i32_1 = arith.constant 0 : i32
    return %arg0, %c0_i32, %c0_i32_0 : i32, i32, i32
  }
}

</mosaic_0001>

<bundles_post_ra>
// kernel: tpu_custom_call.1
= control target key start
LH: loop header
LB: loop body
LE: loop exit
PB: predicated region body
PF: predicated region fallthrough
CT: control target
= control target key end

     0   :  { %s4149_s0 = inlined_call_operand.hbm [shape: f32[2,8,128], index: 0, kind: input, shape index: {}, may-alias: {0,17}]   ;;  %s4150_s1 = inlined_call_operand.hbm [shape: bf16[4,128,128], index: 1, kind: input, shape index: {}]   ;;  %s4151_s2 = inlined_call_operand.hbm [shape: bf16[4,128,128], index: 2, kind: input, shape index: {}]   ;;  %s4152_s3 = inlined_call_operand.hbm [shape: bf16[4,128,128], index: 3, kind: input, shape index: {}]   ;;  %s4153_s4 = inlined_call_operand.vmem [shape: f32[4,1,128], index: 4, kind: input, shape index: {}]   ;;  %s4154_s5 = inlined_call_operand.vmem [shape: f32[4,1,128], index: 5, kind: input, shape index: {}]   ;;  %s4155_s6 = inlined_call_operand.vmem [shape: f32[4,1,128], index: 6, kind: input, shape index: {}]   ;;  %s4156_s7 = inlined_call_operand.hbm [shape: bf16[4,128,128], index: 7, kind: input, shape index: {}]   ;;  %s4157_s8 = inlined_call_operand.vmem [shape: f32[1,128], index: 8, kind: input, shape index: {}]   ;;  %s4158_s9 = inlined_call_operand.vmem [shape: f32[1,128], index: 9, kind: input, shape index: {}]   ;;  %s4159_s10 = inlined_call_operand.vmem [shape: f32[1,128], index: 10, kind: input, shape index: {}]   ;;  %s4160_s11 = inlined_call_operand.hbm [shape: bf16[128,128], index: 11, kind: input, shape index: {}]   ;;  %s4161_s12 = inlined_call_operand.vmem [shape: f32[1,128], index: 12, kind: input, shape index: {}]   ;;  %s4162_s13 = inlined_call_operand.hbm [shape: bf16[128,128], index: 13, kind: input, shape index: {}]   ;;  %s4163_s14 = inlined_call_operand.vmem [shape: f32[1,128], index: 14, kind: input, shape index: {}]   ;;  %s4164_s15 = inlined_call_operand.vmem [shape: f32[1,128], index: 15, kind: input, shape index: {}]   ;;  %s4165_s16 = inlined_call_operand.vmem [shape: f32[1,128], index: 16, kind: input, shape index: {}]   ;;  %s4166_s17 = inlined_call_operand.hbm [shape: f32[2,8,128], index: 17, kind: output, shape index: {}, may-alias: {0,17}]  }
   0x1   :  { %4170 = sst [smem:[#allocation22_spill]] %s4149_s0 }
   0x2   :  { %4171 = sst [smem:[#allocation23_spill]] %s4150_s1 }
   0x3   :  { %4172 = sst [smem:[#allocation24_spill]] %s4151_s2 }
   0x4   :  { %4173 = sst [smem:[#allocation25_spill]] %s4152_s3 }
   0x5   :  { %4174 = sst [smem:[#allocation26_spill]] %s4156_s7 }
   0x6   :  { %4175 = sst [smem:[#allocation27_spill]] %s4160_s11 }
   0x7   :  { %4176 = sst [smem:[#allocation28_spill]] %s4162_s13 }
   0x8   :  { %4177 = sst [smem:[#allocation29_spill]] %s4163_s14 }
   0x9   :  { %4178 = sst [smem:[#allocation30_spill]] %s4164_s15 }
   0xa   :  { %4179 = sst [smem:[#allocation31_spill]] %s4165_s16 }
   0xb   :  { %4180 = sst [smem:[#allocation32_spill]] %s4166_s17 }
   0xc   :  { %22 = vsyncpa [#allocation3], 0 }
   0xd   :  { %24 = vsyncpa [#allocation3 + $0x1], 0 }
   0xe   :  { %25 = vsyncpa [#allocation6], 0 }
   0xf   :  { %26 = vsyncpa [#allocation9], 0 }
  0x10   :  { %27 = vsyncpa [#allocation12], 0 }
  0x11   :  { %28 = vsyncpa [#allocation4], 0 }
  0x12   :  { %30 = vsyncpa [#allocation4 + $0x1], 0  ;;  %s3842_s24 = smov 0   ;;  %s3844_s25 = smov 0  }
  0x13   :  { %s3846_s26 = smov 0   ;;  %s3848_s27 = smov 0  }
  0x14 LB: > { %4181 = sst [smem:[#allocation20_spill]] %s3738_s26  ;;  %s3866_s18 = sadd.s32 4294967295, %s3742_s27   ;;  %s3742_s27 = sphi %s3848_s27, %s4207_s27   ;;  %s3738_s26 = sphi %s3846_s26, %s4204_s26   ;;  %s3734_s25 = sphi %s3844_s25, %s4206_s25   ;;  %s3730_s24 = sphi %s3842_s24, %s4205_s24  }
  0x15   : > { %s4182_s0 = sld [smem:[#allocation23_spill]]  ;;  %p2550_p0 = scmp.ge.s32.totalorder %s3742_s27, 1 }
  0x16   : > { %p57_p1 = scmp.eq.s32.totalorder %s3866_s18, 0  ;;  %p429_p2 = scmp.lt.s32.totalorder %s3742_s27, 3 }
  0x17   : > { %s3744_s1 = smov [#allocation5]   ;;  %s4184_s3 = sld [smem:[#allocation25_spill]] }
  0x18   : > { %p3871_p3 = pnand %p2550_p0, %p429_p2  ;;  %s442_s20 = sshll.u32 %s3744_s1, 4  ;;  %s443_s20 = int_to_ptr.vmem [resolvable:$true] %s442_s20 }
  0x19   : > { %s4186_s11 = sld [smem:[#allocation27_spill]]  ;;  %s3745_s16 = smov [#allocation8]  }
  0x1a   : > { %p3334_p4 = pneg %p3871_p3  ;;  %s470_s17 = sshll.u32 %s3745_s16, 4  ;;  %s471_s17 = int_to_ptr.vmem [resolvable:$true] %s470_s17 }
  0x1b   : > { %s440_s30 = sshll.u32 %s4182_s0, 4  ;;  %s3746_s15 = smov 64   ;;  %s441_s30 = int_to_ptr.hbm [resolvable:$true] %s440_s30 }
  0x1c   : > { %p3883_p6 = pnand %p3334_p4, %p57_p1  ;;  %s3747_s14 = smov 4  }
  0x1d   : > { %s468_s23 = sshll.u32 %s4184_s3, 4  ;;  %s4187_s2 = sld [smem:[#allocation24_spill]]  ;;  %s469_s23 = int_to_ptr.hbm [resolvable:$true] %s468_s23 }
  0x1e   : > { %3337 = dma.hbm_to_vmem [thread:$0]  (!%p3883_p6), %s441_s30, 4096, %s443_s20, [#allocation6], %s3746_s15, %s3746_s15, %s3747_s14  }
  0x1f   : > { %s514_s1 = sshll.u32 %s4186_s11, 4  ;;  %s3748_s16 = smov [#allocation11]   ;;  %s515_s1 = int_to_ptr.hbm [resolvable:$true] %s514_s1 }
  0x20   : > { %3343 = dma.hbm_to_vmem [thread:$0]  (!%p3883_p6), %s469_s23, 4096, %s471_s17, [#allocation9], %s3746_s15, %s3746_s15, %s3747_s14  }
  0x21   : > { %s516_s0 = sshll.u32 %s3748_s16, 4  ;;  %s3749_s30 = smov [#allocation7]   ;;  %s517_s0 = int_to_ptr.vmem [resolvable:$true] %s516_s0 }
  0x22   : > { %3349 = dma.hbm_to_vmem [thread:$0]  (!%p3883_p6), %s515_s1, 1024, %s517_s0, [#allocation12], %s3746_s15, %s3746_s15, %s3747_s14  }
  0x23   : > { %s454_s29 = sshll.u32 %s4187_s2, 4  ;;  %s456_s20 = sshll.u32 %s3749_s30, 4  ;;  %s455_s29 = int_to_ptr.hbm [resolvable:$true] %s454_s29  ;;  %s457_s20 = int_to_ptr.vmem [resolvable:$true] %s456_s20 }
  0x24   : > { %s4188_s7 = sld [smem:[#allocation26_spill]]  ;;  %s3750_s16 = smov [#allocation10]  }
  0x25   : > { %3340 = dma.hbm_to_vmem [thread:$0]  (!%p3883_p6), %s455_s29, 4096, %s457_s20, [#allocation6], %s3746_s15, %s3746_s15, %s3747_s14  }
  0x26   : > { %s4189_s13 = sld [smem:[#allocation28_spill]]  ;;  %s493_s3 = sshll.u32 %s3750_s16, 4  ;;  %s494_s3 = int_to_ptr.vmem [resolvable:$true] %s493_s3 }
  0x27   : > { %s3751_s29 = smov [#allocation13]   ;;  %s2549_s30 = sadd.s32 4294967294, %s3742_s27  }
  0x28   : > { %s533_s0 = sshll.u32 %s3751_s29, 4  ;;  %s3931_s20 = sadd.s32 1, %s3742_s27   ;;  %s534_s0 = int_to_ptr.vmem [resolvable:$true] %s533_s0 }
  0x29   : > { %s40_s17 = ssub.s32 %s3742_s27, %s3931_s20  ;;  %s43_s21 = sadd.s32 1, %s3738_s26 }
  0x2a   : > { %s491_s23 = sshll.u32 %s4188_s7, 4  ;;  %p41_p7 = scmp.eq.s32.totalorder %s40_s17, 0  ;;  %s492_s23 = int_to_ptr.hbm [resolvable:$true] %s491_s23 }
  0x2b   : > { %3346 = dma.hbm_to_vmem [thread:$0]  (!%p3883_p6), %s492_s23, 4096, %s494_s3, [#allocation9], %s3746_s15, %s3746_s15, %s3747_s14  }
  0x2c   : > { %s531_s22 = sshll.u32 %s4189_s13, 4  ;;  %p50_p8 = scmp.ne.s32.totalorder %s3738_s26, %s3734_s25  ;;  %s532_s22 = int_to_ptr.hbm [resolvable:$true] %s531_s22 }
  0x2d   : > { %3352 = dma.hbm_to_vmem [thread:$0]  (!%p3883_p6), %s532_s22, 1024, %s534_s0, [#allocation12], %s3746_s15, %s3746_s15, %s3747_s14  }
  0x2e   : > { %p51_p9 = scmp.eq.s32.totalorder %s3742_s27, 0  ;;  %p56_p10 = scmp.ne.s32.totalorder %s3734_s25, %s3730_s24 }
  0x2f   : > { %s3942_s23 = scalar_select %p41_p7, %s3738_s26, %s43_s21  }
  0x30   : > { %p3944_p11 = por %p51_p9, %p50_p8  ;;  %p3950_p12 = por %p57_p1, %p56_p10 }
  0x31   : > { %4190 = sst [smem:[#allocation21_spill]] %s3942_s23  ;;  %p416_p13 = scmp.eq.s32.totalorder %s3866_s18, 1 }
  0x32   : > { %p422_p0 = scmp.eq.s32.totalorder %s2549_s30, 1  ;;  %p3367_p2 = scmp.lt.s32.totalorder %s3742_s27, 2 }
  0x33   : > { %s556_s15 = sand.u32 1, %s3738_s26   ;;  %p3957_p4 = por %p416_p13, %p50_p8 }
  0x34   : > { %p3961_p6 = por %p422_p0, %p56_p10  ;;  %s2558_s16 = sshll.u32 %s556_s15, 3 }
  0x35   : > { %s2559_s3 = sshll.u32 %s3742_s27, 3  ;;  %s4195_s17 = sld [smem:[#allocation22_spill]] }
  0x36   : > { %s560_s2 = scalar_lea.vmem [#allocation2], %s2558_s16  ;;  %p3971_p7 = pnand %p3367_p2, %p3944_p11 }
  0x37   : > { %s568_s7 = sshll.u32 %s560_s2, 4  ;;  %s557_s13 = scalar_lea.sflag [#allocation3], %s556_s15  ;;  %s569_s7 = int_to_ptr.vmem [resolvable:$true] %s568_s7 }
  0x38   : > { %p3638_p9 = pneg %p3971_p7 }
  0x3b   : > { %s564_s21 = scalar_lea.hbm %s4195_s17, %s2559_s3  ;;  %s3641_s3 = scalar_lea.hbm %s4195_s17, 16 }
  0x3c   : > { %s566_s11 = sshll.u32 %s564_s21, 4  ;;  %s567_s11 = int_to_ptr.hbm [resolvable:$true] %s566_s11 }
  0x3d   : > { %s3634_s23 = sshra.s32 %s567_s11, 4  ;;  %s3635_s23 = int_to_ptr.hbm [resolvable:$true] %s3634_s23 }
  0x3e   : > { %s3636_s26 = scalar_lea.hbm %s3635_s23, 8  ;;  %p3642_p11 = scmp.lt.s32.totalorder %s3635_s23, %s4195_s17 }
  0x3f   : > { %p3637_p8 = scmp.ne.s32.totalorder %s3635_s23, %s3636_s26  ;;  %p3643_p0 = scmp.lt.s32.totalorder %s3641_s3, %s3636_s26 }
  0x41   : > { %p3639_p10 = pnand %p3638_p9, %p3637_p8  ;;  %p3644_p2 = por %p3643_p0, %p3642_p11 }
  0x43   : > { %p3640_p13 = pneg %p3639_p10 }
  0x45   : > { %p3645_p5 = pnand %p3644_p2, %p3640_p13 }
  0x47   : > { %3648 = shalt.err (!%p3645_p5)
}
  0x48   : > { %3356 = dma.hbm_to_vmem [thread:$0]  (!%p3971_p7), %s567_s11, 128, %s569_s7, %s557_s13  }
  0x49   : > { %577 = sbr.rel (%p3871_p3) target bundleno = 3102 (0xc1e), region = 88  ;;  %s3988_s15 = sand.u32 (!%p3871_p3), 1, %s3734_s25  }
  0x4a   : > { %s2561_s0 = sshll.u32 (!%p3871_p3), %s3988_s15, 3  ;;  %s580_s21 = scalar_lea.sflag (!%p3871_p3), [#allocation3], %s3988_s15 }
  0x4b   : > { %s3994_s26 = scalar_lea.vmem (!%p3871_p3), [#allocation2], %s2561_s0 }
  0x4e   : > { %3709 = dma.done.wait (%p3950_p12), %s580_s21, 128  }
  0x4f   : > { %3711 = vsyncadd (%p3950_p12), %s580_s21, 4294967168 }
  0x50   : > { %3713 = dma.done.wait (%p57_p1), [#allocation6], 8192  }
  0x51   : > { %3715 = vsyncadd (%p57_p1), [#allocation6], 4294959104 }
  0x52   : > { %3717 = dma.done.wait (%p57_p1), [#allocation9], 8192  }
  0x53   : > { %3719 = vsyncadd (%p57_p1), [#allocation9], 4294959104 }
  0x54   : > { %3721 = dma.done.wait (%p57_p1), [#allocation12], 2048  }
  0x55   : > { %3723 = vsyncadd (%p57_p1), [#allocation12], 4294965248  ;;  %v3169_v0 = vld [vmem:[#allocation5 + $0x38] sm:$0xff]  ;;  %v3168_v2 = vld [vmem:[#allocation5 + $0x30] sm:$0xff]  ;;  %vm927_vm0 = vcmask 64512   ;;  %vm944_vm1 = vcmask 1043456  }
  0x56   : > { %v3177_v1 = vld [vmem:[#allocation7 + $0x38] sm:$0xff]  ;;  %736 = vmatpush.bf16.msra.mxu0 %v3169_v0  ;;  %v3176_v3 = vld [vmem:[#allocation7 + $0x30] sm:$0xff]  ;;  %v3167_v4 = vld [vmem:[#allocation5 + $0x28] sm:$0xff]  ;;  %s4197_s30 = sld [smem:[#allocation29_spill]]  ;;  %s3159_s16 = sshll.u32 %s3866_s18, 3 }
  0x57   : > { %817 = vmatpush.bf16.msra.mxu1 %v3177_v1  ;;  %v3175_v5 = vld [vmem:[#allocation7 + $0x28] sm:$0xff]  ;;  %v3166_v6 = vld [vmem:[#allocation5 + $0x20] sm:$0xff]  ;;  %v3165_v8 = vld [vmem:[#allocation5 + $0x18] sm:$0xff]  ;;  %s4198_s29 = sld [smem:[#allocation30_spill]]  ;;  %s664_s18 = scalar_lea.vmem [#allocation14], %s2561_s0 }
  0x58   : > { %v3174_v7 = vld [vmem:[#allocation7 + $0x20] sm:$0xff]  ;;  %v3173_v9 = vld [vmem:[#allocation7 + $0x18] sm:$0xff]  ;;  %v3164_v10 = vld [vmem:[#allocation5 + $0x10] sm:$0xff]  ;;  %s4201_s23 = sld [smem:[#allocation31_spill]]  ;;  %s2419_s14 = sshll.u32 %s664_s18, 4  ;;  %s2420_s14 = int_to_ptr.vmem [resolvable:$true] %s2419_s14 }
  0x59   : > { %v3172_v11 = vld [vmem:[#allocation7 + $0x10] sm:$0xff]  ;;  %v3163_v12 = vld [vmem:[#allocation5 + $0x8] sm:$0xff]  ;;  %v3162_v14 = vld [vmem:[#allocation5] sm:$0xff]  ;;  %s2407_s2 = scalar_lea.sflag [#allocation4], %s3988_s15 }
  0x5a   : > { %737 = vmatpush.bf16.msra.mxu0 %v3168_v2  ;;  %v3171_v13 = vld [vmem:[#allocation7 + $0x8] sm:$0xff]  ;;  %v3170_v15 = vld [vmem:[#allocation7] sm:$0xff]  ;;  %v4013_v16 = vld [vmem:[%s3994_s26] sm:$0xff]  ;;  %s4199_s26 = sld [smem:[#allocation32_spill]] }
  0x5b   : > { %818 = vmatpush.bf16.msra.mxu1 %v3176_v3  ;;  %v4017_v17 = vpack.c.bf16 %v4013_v16, %v4013_v16  ;;  %v3416_v18 = vld [vmem:[%s4154_s5] ss:$0 sm:$0xff]  ;;  %v3185_v28 = vld [vmem:[#allocation8 + $0x38] sm:$0xff]  ;;  %v3183_v30 = vld [vmem:[#allocation8 + $0x28] sm:$0xff] }
  0x5c   : > { %v3415_v19 = vld [vmem:[%s4153_s4] ss:$0 sm:$0xff]  ;;  %898 = vmatpush.bf16.msra.mxu2 %v3185_v28  ;;  %v3182_v31 = vld [vmem:[#allocation8 + $0x20] sm:$0xff]  ;;  %v3181_v32 = vld [vmem:[#allocation8 + $0x18] sm:$0xff] }
  0x5d   : > { %v3184_v29 = vld [vmem:[#allocation8 + $0x30] sm:$0xff]  ;;  %v3179_v34 = vld [vmem:[#allocation8 + $0x8] sm:$0xff]  ;;  %v3178_v37 = vld [vmem:[#allocation8] sm:$0xff] }
  0x5e   : > { %738 = vmatpush.bf16.msra.mxu0 %v3167_v4  ;;  %v3180_v33 = vld [vmem:[#allocation8 + $0x10] sm:$0xff]  ;;  %v3209_v40 = vld [vmem:[#allocation7 + $0x78] sm:$0xff]  ;;  %v3207_v42 = vld [vmem:[#allocation7 + $0x68] sm:$0xff] }
  0x5f   : > { %819 = vmatpush.bf16.msra.mxu1 %v3175_v5  ;;  %v3208_v41 = vld [vmem:[#allocation7 + $0x70] sm:$0xff]  ;;  %v3206_v46 = vld [vmem:[#allocation7 + $0x60] sm:$0xff]  ;;  %v3201_v53 = vld [vmem:[#allocation5 + $0x78] sm:$0xff] }
  0x60   : > { %899 = vmatpush.bf16.msra.mxu2 %v3184_v29  ;;  %v3417_v49 = vld [vmem:[%s4155_s6] ss:$0 sm:$0xff]  ;;  %v3205_v57 = vld [vmem:[#allocation7 + $0x58] sm:$0xff]  ;;  %v3199_v58 = vld [vmem:[#allocation5 + $0x68] sm:$0xff]  ;;  %s4200_s7 = smov %s4199_s26  ;;  %s2417_s11 = scalar_lea.hbm %s4199_s26, %s3159_s16 }
  0x61   : > { %v3200_v56 = vld [vmem:[#allocation5 + $0x70] sm:$0xff]  ;;  %v3198_v60 = vld [vmem:[#allocation5 + $0x60] sm:$0xff]  ;;  %v3203_v61 = vld [vmem:[#allocation7 + $0x48] sm:$0xff]  ;;  %s3684_s21 = scalar_lea.hbm %s4200_s7, 16 }
  0x62   : > { %739 = vmatpush.bf16.msra.mxu0 %v3166_v6  ;;  %v3204_v59 = vld [vmem:[#allocation7 + $0x50] sm:$0xff]  ;;  %v3197_v62 = vld [vmem:[#allocation5 + $0x58] sm:$0xff]  ;;  %v3202_v63 = vld [vmem:[#allocation7 + $0x40] sm:$0xff] }
  0x63   : > { %820 = vmatpush.bf16.msra.mxu1 %v3174_v7  ;;  %v3196_v0 = vld [vmem:[#allocation5 + $0x50] sm:$0xff]  ;;  %v3195_v1 = vld [vmem:[#allocation5 + $0x48] sm:$0xff]  ;;  %v3194_v2 = vld [vmem:[#allocation5 + $0x40] sm:$0xff] }
  0x64   : > { %900 = vmatpush.bf16.msra.mxu2 %v3183_v30  ;;  %v3193_v3 = vld [vmem:[#allocation10 + $0x38] sm:$0xff]  ;;  %v3192_v4 = vld [vmem:[#allocation10 + $0x30] sm:$0xff]  ;;  %v3191_v6 = vld [vmem:[#allocation10 + $0x28] sm:$0xff] }
  0x65   : > { %v3190_v7 = vld [vmem:[#allocation10 + $0x20] sm:$0xff] }
  0x66   : > { %740 = vmatpush.bf16.msra.mxu0 %v3165_v8 }
  0x67   : > { %821 = vmatpush.bf16.msra.mxu1 %v3173_v9 }
  0x68   : > { %901 = vmatpush.bf16.msra.mxu2 %v3182_v31  ;;  %v3217_v31 = vld [vmem:[#allocation8 + $0x78] sm:$0xff] }
  0x6a   : > { %741 = vmatpush.bf16.msra.mxu0 %v3164_v10 }
  0x6b   : > { %822 = vmatpush.bf16.msra.mxu1 %v3172_v11  ;;  %v3189_v11 = vld [vmem:[#allocation10 + $0x18] sm:$0xff] }
  0x6c   : > { %902 = vmatpush.bf16.msra.mxu2 %v3181_v32  ;;  %v3216_v32 = vld [vmem:[#allocation8 + $0x70] sm:$0xff] }
  0x6e   : > { %742 = vmatpush.bf16.msra.mxu0 %v3163_v12  ;;  %v3188_v12 = vld [vmem:[#allocation10 + $0x10] sm:$0xff] }
  0x6f   : > { %823 = vmatpush.bf16.msra.mxu1 %v3171_v13  ;;  %v3187_v13 = vld [vmem:[#allocation10 + $0x8] sm:$0xff] }
  0x70   : > { %903 = vmatpush.bf16.msra.mxu2 %v3180_v33  ;;  %v3215_v33 = vld [vmem:[#allocation8 + $0x68] sm:$0xff] }
  0x72   : > { %743 = vmatpush.bf16.msra.mxu0 %v3162_v14  ;;  %v3186_v14 = vld [vmem:[#allocation10] sm:$0xff] }
  0x73   : > { %824 = vmatpush.bf16.msra.mxu1 %v3170_v15  ;;  %v3418_v15 = vld [vmem:[%s4154_s5 + $0x1] ss:$0 sm:$0xff] }
  0x74   : > { %904 = vmatpush.bf16.msra.mxu2 %v3179_v34 }
  0x75   : > { %744 = vmatmul.bf16.vlgmr.msra.gmra.mxu0 %v4017_v17 }
  0x76   : > { %825 = vmatmul.bf16.vlgmr.msra.gmra.mxu1 %v4017_v17 }
  0x77   : > { %1214 = vmatpush.bf16.msrb.mxu1 %v3217_v31 }
  0x78   : > { %905 = vmatpush.bf16.msra.mxu2 %v3178_v37  ;;  %v3212_v37 = vld [vmem:[#allocation8 + $0x50] sm:$0xff] }
  0x7b   : > { %906 = vmatmul.bf16.vlgmr.msra.gmra.mxu2 %v4017_v17  ;;  %1215 = vmatpush.bf16.msrb.mxu1 %v3216_v32 }
  0x7f   : > { %1216 = vmatpush.bf16.msrb.mxu1 %v3215_v33 }
  0xf2   : > { %v745_v20 = vpop.f32.mrf.mxu0 }
  0xf3   : > { %v826_v21 = vpop.f32.mrf.mxu1  ;;  %v746_v24 = vadd.f32 %v3415_v19, %v745_v20 }
  0xf4   : > { %v827_v22 = vadd.f32 %v3416_v18, %v826_v21 }
  0xf5   : > { %v911_v25 = vpack.c.bf16 %v746_v24, %v746_v24 }
  0xf6   : > { %v912_v23 = vpack.c.bf16 %v827_v22, %v827_v22 }
  0xf8   : > { %920 = vmatpush.bf16.xpose.msrb.mxu0 %v912_v23 }
  0xfa   : > { %v747_v26 = vpop.f32.mrf.mxu0 }
  0xfb   : > { %v828_v27 = vpop.f32.mrf.mxu1 }
  0xfe   : > { %v907_v50 = vpop.f32.mrf.mxu2 }
  0xff   : > { %921 = vmatmul.bf16.vlgmr.msrb.gmra.mxu0 %v911_v25  ;;  %v908_v51 = vadd.f32 %v3417_v49, %v907_v50  ;;  %v3419_v25 = vld [vmem:[%s4153_s4 + $0x1] ss:$0 sm:$0xff] }
 0x100   : > { %1131 = vmatpush.bf16.msra.mxu0 %v3209_v40  ;;  %v3420_v49 = vld [vmem:[%s4155_s6 + $0x1] ss:$0 sm:$0xff] }
 0x101   : > { %v940_v52 = vpack.c.bf16 %v908_v51, %v908_v51 }
 0x103   : > { %v946_v54 = vsel %vm944_vm1, %v940_v52, 0 }
 0x104   : > { %1132 = vmatpush.bf16.msra.mxu0 %v3208_v41  ;;  %955 = vmatpush.bf16.msra.mxu3 %v946_v54  ;;  %v3210_v41 = vld [vmem:[#allocation8 + $0x40] sm:$0xff] }
 0x106   : > { %v909_v55 = vpop.f32.mrf.mxu2 }
 0x108   : > { %1133 = vmatpush.bf16.msra.mxu0 %v3207_v42  ;;  %1048 = vmatpush.bf16.msrb.mxu3 %v3201_v53  ;;  %v3241_v53 = vld [vmem:[#allocation7 + $0xb8] sm:$0xff] }
 0x10c   : > { %1134 = vmatpush.bf16.msra.mxu0 %v3206_v46  ;;  %1049 = vmatpush.bf16.msrb.mxu3 %v3200_v56  ;;  %v3240_v56 = vld [vmem:[#allocation7 + $0xb0] sm:$0xff] }
 0x110   : > { %1135 = vmatpush.bf16.msra.mxu0 %v3205_v57  ;;  %1050 = vmatpush.bf16.msrb.mxu3 %v3199_v58  ;;  %v3233_v57 = vld [vmem:[#allocation5 + $0xb8] sm:$0xff]  ;;  %v3239_v58 = vld [vmem:[#allocation7 + $0xa8] sm:$0xff] }
 0x114   : > { %1136 = vmatpush.bf16.msra.mxu0 %v3204_v59  ;;  %1051 = vmatpush.bf16.msrb.mxu3 %v3198_v60  ;;  %v3232_v59 = vld [vmem:[#allocation5 + $0xb0] sm:$0xff]  ;;  %v3238_v60 = vld [vmem:[#allocation7 + $0xa0] sm:$0xff] }
 0x118   : > { %1137 = vmatpush.bf16.msra.mxu0 %v3203_v61  ;;  %1052 = vmatpush.bf16.msrb.mxu3 %v3197_v62  ;;  %v3231_v61 = vld [vmem:[#allocation5 + $0xa8] sm:$0xff]  ;;  %v3237_v62 = vld [vmem:[#allocation7 + $0x98] sm:$0xff] }
 0x11c   : > { %1138 = vmatpush.bf16.msra.mxu0 %v3202_v63  ;;  %1053 = vmatpush.bf16.msrb.mxu3 %v3196_v0  ;;  %v3230_v63 = vld [vmem:[#allocation5 + $0xa0] sm:$0xff]  ;;  %v3236_v0 = vld [vmem:[#allocation7 + $0x90] sm:$0xff] }
 0x11f   : > { %1139 = vmatmul.bf16.vlgmr.msra.gmra.mxu0 %v4017_v17 }
 0x120   : > { %1054 = vmatpush.bf16.msrb.mxu3 %v3195_v1  ;;  %1402 = vmatpush.bf16.msrb.mxu0 %v3193_v3  ;;  %v3229_v1 = vld [vmem:[#allocation5 + $0x98] sm:$0xff]  ;;  %v3228_v3 = vld [vmem:[#allocation5 + $0x90] sm:$0xff] }
 0x124   : > { %1055 = vmatpush.bf16.msrb.mxu3 %v3194_v2  ;;  %1403 = vmatpush.bf16.msrb.mxu0 %v3192_v4  ;;  %v3235_v2 = vld [vmem:[#allocation7 + $0x88] sm:$0xff]  ;;  %v3234_v4 = vld [vmem:[#allocation7 + $0x80] sm:$0xff] }
 0x128   : > { %1404 = vmatpush.bf16.msrb.mxu0 %v3191_v6  ;;  %v3226_v6 = vld [vmem:[#allocation5 + $0x80] sm:$0xff] }
 0x12c   : > { %1405 = vmatpush.bf16.msrb.mxu0 %v3190_v7  ;;  %v3225_v7 = vld [vmem:[#allocation10 + $0x78] sm:$0xff] }
 0x130   : > { %1406 = vmatpush.bf16.msrb.mxu0 %v3189_v11  ;;  %v3222_v11 = vld [vmem:[#allocation10 + $0x60] sm:$0xff] }
 0x134   : > { %1407 = vmatpush.bf16.msrb.mxu0 %v3188_v12 }
 0x138   : > { %1408 = vmatpush.bf16.msrb.mxu0 %v3187_v13 }
 0x13c   : > { %1409 = vmatpush.bf16.msrb.mxu0 %v3186_v14 }
 0x17c   : > { %v922_v35 = vpop.f32.mrf.mxu0 }
 0x17d   : > { %v926_v36 = vmul.f32 0.35355338, %v922_v35  ;;  %v3214_v35 = vld [vmem:[#allocation8 + $0x60] sm:$0xff] }
 0x17e   : > { %1217 = vmatpush.bf16.msrb.mxu1 %v3214_v35  ;;  %v3249_v35 = vld [vmem:[#allocation8 + $0xb8] sm:$0xff] }
 0x17f   : > { %v928_v38 = vsel %vm927_vm0, %v926_v36, -inf }
 0x180   : > { %929 = vmax.xlane.f32.xlu0 %v928_v38  ;;  %v3211_v38 = vld [vmem:[#allocation8 + $0x48] sm:$0xff] }
 0x184   : > { %v924_v39 = vpop.f32.mrf.mxu0 }
 0x19c   : > { %v1140_v18 = vpop.f32.mrf.mxu0 }
 0x19d   : > { %v1141_v19 = vadd.f32 %v3418_v15, %v1140_v18  ;;  %v3221_v15 = vld [vmem:[#allocation10 + $0x58] sm:$0xff]  ;;  %v3220_v18 = vld [vmem:[#allocation10 + $0x50] sm:$0xff] }
 0x19f   : > { %v1228_v20 = vpack.c.bf16 %v1141_v19, %v1141_v19  ;;  %v3219_v19 = vld [vmem:[#allocation10 + $0x48] sm:$0xff] }
 0x1a1   : > { %1236 = vmatpush.bf16.xpose.msrb.mxu2 %v1228_v20  ;;  %v3218_v20 = vld [vmem:[#allocation10 + $0x40] sm:$0xff] }
 0x1a4   : > { %v1142_v21 = vpop.f32.mrf.mxu0 }
 0x1f3   : > { %v930_v43 = vpop.xlane.xlu0 %929 }
 0x1f4   : > { %v931_v44 = vsub.f32 %v926_v36, %v930_v43  ;;  %v3213_v36 = vld [vmem:[#allocation8 + $0x58] sm:$0xff] }
 0x1f5   : > { %1218 = vmatpush.bf16.msrb.mxu1 %v3213_v36  ;;  %v3248_v36 = vld [vmem:[#allocation8 + $0xb0] sm:$0xff] }
 0x1f6   : > { %v932_v45 = vmul.f32 1.442695, %v931_v44 }
 0x1f8   : > { %3434 = vpow2.f32 %v932_v45 }
 0x1f9   : > { %1219 = vmatpush.bf16.msrb.mxu1 %v3212_v37 }
 0x1fd   : > { %1220 = vmatpush.bf16.msrb.mxu1 %v3211_v38  ;;  %v3247_v38 = vld [vmem:[#allocation8 + $0xa8] sm:$0xff] }
 0x1fe   : > { %v3435_v47 = vpop.eup %3434 }
 0x1ff   : > { %v934_v48 = vsel %vm927_vm0, %v3435_v47, 0.0 }
 0x200   : > { %935 = vadd.xlane.f32.xlu0 %v934_v48 }
 0x201   : > { %1221 = vmatpush.bf16.msrb.mxu1 %v3210_v41  ;;  %v3245_v41 = vld [vmem:[#allocation8 + $0x98] sm:$0xff] }
 0x204   : > { %1222 = vmatmul.bf16.vlgmr.msrb.gmra.mxu1 %v4017_v17 }
 0x205   : > { %1485 = vmatpush.bf16.msra.mxu1 %v3233_v57 }
 0x209   : > { %1486 = vmatpush.bf16.msra.mxu1 %v3232_v59 }
 0x20d   : > { %1487 = vmatpush.bf16.msra.mxu1 %v3231_v61  ;;  %v3265_v61 = vld [vmem:[#allocation5 + $0xf8] sm:$0xff] }
 0x211   : > { %1488 = vmatpush.bf16.msra.mxu1 %v3230_v63  ;;  %v3272_v63 = vld [vmem:[#allocation7 + $0xf0] sm:$0xff] }
 0x215   : > { %1489 = vmatpush.bf16.msra.mxu1 %v3229_v1  ;;  %v3271_v1 = vld [vmem:[#allocation7 + $0xe8] sm:$0xff] }
 0x219   : > { %1490 = vmatpush.bf16.msra.mxu1 %v3228_v3  ;;  %v3270_v3 = vld [vmem:[#allocation7 + $0xe0] sm:$0xff] }
 0x273   : > { %v936_v5 = vpop.xlane.xlu0 %935 }
 0x274   : > { %3436 = vrcp.f32 %v936_v5  ;;  %v3227_v5 = vld [vmem:[#allocation5 + $0x88] sm:$0xff] }
 0x275   : > { %1491 = vmatpush.bf16.msra.mxu1 %v3227_v5  ;;  %v3269_v5 = vld [vmem:[#allocation7 + $0xd8] sm:$0xff] }
 0x279   : > { %1492 = vmatpush.bf16.msra.mxu1 %v3226_v6  ;;  %v3260_v6 = vld [vmem:[#allocation5 + $0xd0] sm:$0xff] }
 0x27a   : > { %v3437_v8 = vpop.eup %3436 }
 0x27b   : > { %v938_v9 = vmul.f32 %v3437_v8, %v3435_v47  ;;  %v3224_v8 = vld [vmem:[#allocation10 + $0x70] sm:$0xff] }
 0x27c   : > { %1493 = vmatmul.bf16.vlgmr.msra.gmra.mxu1 %v4017_v17 }
 0x27d   : > { %v939_v10 = vpack.c.bf16 %v938_v9, %v938_v9 }
 0x27f   : > { %2665 = vmatmul.msk.bf16.vlgmr.msra.gmra.mxu3 %vm927_vm0, %v939_v10  ;;  %v3223_v10 = vld [vmem:[#allocation10 + $0x68] sm:$0xff] }
 0x280   : > { %1341 = vmatpush.bf16.msra.mxu3 %v3225_v7  ;;  %v3268_v7 = vld [vmem:[#allocation7 + $0xd0] sm:$0xff] }
 0x281   : > { %v1223_v50 = vpop.f32.mrf.mxu1 }
 0x282   : > { %v1224_v51 = vadd.f32 %v3420_v49, %v1223_v50 }
 0x284   : > { %v1255_v52 = vpack.c.bf16 %v1224_v51, %v1224_v51  ;;  %1342 = vmatpush.bf16.msra.mxu3 %v3224_v8  ;;  %v3259_v8 = vld [vmem:[#allocation5 + $0xc8] sm:$0xff] }
 0x286   : > { %v1260_v54 = vsel %vm944_vm1, %v1255_v52, 0 }
 0x287   : > { %1269 = vmatpush.bf16.msra.mxu2 %v1260_v54  ;;  %v3423_v54 = vld [vmem:[%s4155_s6 + $0x2] ss:$0 sm:$0xff] }
 0x288   : > { %1343 = vmatpush.bf16.msra.mxu3 %v3223_v10  ;;  %v3266_v10 = vld [vmem:[#allocation7 + $0xc0] sm:$0xff] }
 0x289   : > { %v1225_v55 = vpop.f32.mrf.mxu1 }
 0x28c   : > { %1344 = vmatpush.bf16.msra.mxu3 %v3222_v11  ;;  %v3258_v11 = vld [vmem:[#allocation5 + $0xc0] sm:$0xff] }
 0x28f   : > { %1056 = vmatmul.bf16.vlgmr.msrb.gmra.mxu3 %v4017_v17 }
 0x290   : > { %1345 = vmatpush.bf16.msra.mxu3 %v3221_v15  ;;  %v3255_v15 = vld [vmem:[#allocation10 + $0xa8] sm:$0xff] }
 0x294   : > { %1346 = vmatpush.bf16.msra.mxu3 %v3220_v18  ;;  %v3254_v18 = vld [vmem:[#allocation10 + $0xa0] sm:$0xff] }
 0x298   : > { %1347 = vmatpush.bf16.msra.mxu3 %v3219_v19 }
 0x29c   : > { %1348 = vmatpush.bf16.msra.mxu3 %v3218_v20 }
 0x2a0   : > { %1651 = vmatpush.bf16.msrb.mxu3 %v3249_v35 }
 0x2a4   : > { %1652 = vmatpush.bf16.msrb.mxu3 %v3248_v36 }
 0x2a8   : > { %1653 = vmatpush.bf16.msrb.mxu3 %v3247_v38 }
 0x2f9   : > { %v1494_v21 = vpop.f32.mrf.mxu1 }
 0x302   : > { %v957_v22 = vpop.f32.mrf.mxu3 }
 0x303   : > { %v961_v23 = vpack.c.bf16 %v957_v22, %v957_v22  ;;  %v1496_v22 = vpop.f32.mrf.mxu1 }
 0x304   : > { %v3253_v22 = vld [vmem:[#allocation10 + $0x98] sm:$0xff] }
 0x305   : > { %1410 = vmatmul.bf16.vlgmr.msrb.gmra.mxu0 %v961_v23 }
 0x30a   : > { %v959_v24 = vpop.f32.mrf.mxu3 }
 0x312   : > { %v1057_v26 = vpop.f32.mrf.mxu3 }
 0x313   : > { %v1058_v27 = vadd.f32 %v3419_v25, %v1057_v26  ;;  %v3422_v26 = vld [vmem:[%s4154_s5 + $0x2] ss:$0 sm:$0xff] }
 0x315   : > { %v1227_v28 = vpack.c.bf16 %v1058_v27, %v1058_v27  ;;  %v3421_v27 = vld [vmem:[%s4153_s4 + $0x2] ss:$0 sm:$0xff] }
 0x316   : > { %v1495_v32 = vadd.f32 %v3421_v27, %v1494_v21 }
 0x317   : > { %1237 = vmatmul.bf16.vlgmr.msrb.gmra.mxu2 %v1227_v28 }
 0x318   : > { %1568 = vmatpush.bf16.msrb.mxu2 %v3241_v53  ;;  %v1664_v33 = vpack.c.bf16 %v1495_v32, %v1495_v32  ;;  %v3424_v32 = vld [vmem:[%s4154_s5 + $0x3] ss:$0 sm:$0xff] }
 0x31a   : > { %v1059_v29 = vpop.f32.mrf.mxu3 }
 0x31c   : > { %1569 = vmatpush.bf16.msrb.mxu2 %v3240_v56 }
 0x320   : > { %1570 = vmatpush.bf16.msrb.mxu2 %v3239_v58  ;;  %v3273_v58 = vld [vmem:[#allocation7 + $0xf8] sm:$0xff] }
 0x324   : > { %1571 = vmatpush.bf16.msrb.mxu2 %v3238_v60 }
 0x328   : > { %1572 = vmatpush.bf16.msrb.mxu2 %v3237_v62  ;;  %v3264_v62 = vld [vmem:[#allocation5 + $0xf0] sm:$0xff] }
 0x32c   : > { %1573 = vmatpush.bf16.msrb.mxu2 %v3236_v0  ;;  %v3263_v0 = vld [vmem:[#allocation5 + $0xe8] sm:$0xff] }
 0x330   : > { %1574 = vmatpush.bf16.msrb.mxu2 %v3235_v2  ;;  %v3262_v2 = vld [vmem:[#allocation5 + $0xe0] sm:$0xff] }
 0x334   : > { %1575 = vmatpush.bf16.msrb.mxu2 %v3234_v4  ;;  %v3261_v4 = vld [vmem:[#allocation5 + $0xd8] sm:$0xff] }
 0x382   : > { %v4043_v30 = vpop.f32.mrf.mxu0 }
 0x38a   : > { %v1413_v34 = vpop.f32.mrf.mxu0 }
 0x39a   : > { %v1238_v39 = vpop.f32.mrf.mxu2 }
 0x39b   : > { %v1242_v40 = vmul.f32 0.35355338, %v1238_v39  ;;  %v3246_v39 = vld [vmem:[#allocation8 + $0xa0] sm:$0xff] }
 0x39c   : > { %1654 = vmatpush.bf16.msrb.mxu3 %v3246_v39 }
 0x39d   : > { %v1243_v42 = vsel %vm927_vm0, %v1242_v40, -inf }
 0x39e   : > { %1244 = vmax.xlane.f32.xlu1 %v1243_v42  ;;  %v3244_v42 = vld [vmem:[#allocation8 + $0x90] sm:$0xff] }
 0x3a0   : > { %1655 = vmatpush.bf16.msrb.mxu3 %v3245_v41 }
 0x3a2   : > { %v1240_v43 = vpop.f32.mrf.mxu2 }
 0x3a3   : > { %v3243_v43 = vld [vmem:[#allocation8 + $0x88] sm:$0xff] }
 0x3a4   : > { %1656 = vmatpush.bf16.msrb.mxu3 %v3244_v42 }
 0x3a8   : > { %1657 = vmatpush.bf16.msrb.mxu3 %v3243_v43 }
 0x411   : > { %v1245_v44 = vpop.xlane.xlu1 %1244 }
 0x412   : > { %v1246_v45 = vsub.f32 %v1242_v40, %v1245_v44 }
 0x414   : > { %v1247_v46 = vmul.f32 1.442695, %v1246_v45 }
 0x416   : > { %3438 = vpow2.f32 %v1247_v46  ;;  %v3242_v46 = vld [vmem:[#allocation8 + $0x80] sm:$0xff] }
 0x417   : > { %1658 = vmatpush.bf16.msrb.mxu3 %v3242_v46  ;;  %v3279_v46 = vld [vmem:[#allocation8 + $0xe8] sm:$0xff] }
 0x41c   : > { %v3439_v47 = vpop.eup %3438 }
 0x41d   : > { %v1249_v48 = vsel %vm927_vm0, %v3439_v47, 0.0 }
 0x41e   : > { %1250 = vadd.xlane.f32.xlu1 %v1249_v48 }
 0x491   : > { %v1251_v9 = vpop.xlane.xlu1 %1250 }
 0x492   : > { %3440 = vrcp.f32 %v1251_v9  ;;  %v3267_v9 = vld [vmem:[#allocation7 + $0xc8] sm:$0xff] }
 0x498   : > { %v3441_v12 = vpop.eup %3440 }
 0x499   : > { %v1253_v13 = vmul.f32 %v3441_v12, %v3439_v47  ;;  %v3257_v12 = vld [vmem:[#allocation10 + $0xb8] sm:$0xff] }
 0x49b   : > { %v1254_v14 = vpack.c.bf16 %v1253_v13, %v1253_v13  ;;  %v3256_v13 = vld [vmem:[#allocation10 + $0xb0] sm:$0xff] }
 0x49d   : > { %2765 = vmatmul.msk.bf16.vlgmr.msra.gmra.mxu2 %vm927_vm0, %v1254_v14 }
 0x49e   : > { %1778 = vmatpush.bf16.msra.mxu2 %v3257_v12  ;;  %v3282_v12 = vld [vmem:[#allocation10 + $0xc0] sm:$0xff] }
 0x4a2   : > { %1779 = vmatpush.bf16.msra.mxu2 %v3256_v13 }
 0x4a6   : > { %1780 = vmatpush.bf16.msra.mxu2 %v3255_v15 }
 0x4aa   : > { %1781 = vmatpush.bf16.msra.mxu2 %v3254_v18  ;;  %v3427_v18 = vld [vmem:[%s4157_s8] ss:$0 sm:$0xff] }
 0x4ad   : > { %1576 = vmatmul.bf16.vlgmr.msrb.gmra.mxu2 %v4017_v17 }
 0x4ae   : > { %1782 = vmatpush.bf16.msra.mxu2 %v3253_v22 }
 0x520   : > { %v1271_v23 = vpop.f32.mrf.mxu2 }
 0x521   : > { %v1275_v24 = vpack.c.bf16 %v1271_v23, %v1271_v23  ;;  %v3252_v23 = vld [vmem:[#allocation10 + $0x90] sm:$0xff] }
 0x522   : > { %1783 = vmatpush.bf16.msra.mxu2 %v3252_v23 }
 0x523   : > { %1349 = vmatmul.bf16.vlgmr.msra.gmra.mxu3 %v1275_v24  ;;  %v3251_v24 = vld [vmem:[#allocation10 + $0x88] sm:$0xff] }
 0x526   : > { %1784 = vmatpush.bf16.msra.mxu2 %v3251_v24 }
 0x528   : > { %v1273_v25 = vpop.f32.mrf.mxu2 }
 0x529   : > { %v3250_v25 = vld [vmem:[#allocation10 + $0x80] sm:$0xff] }
 0x52a   : > { %1785 = vmatpush.bf16.msra.mxu2 %v3250_v25  ;;  %v3297_v25 = vld [vmem:[#allocation11 + $0x38] sm:$0xff] }
 0x530   : > { %v1577_v28 = vpop.f32.mrf.mxu2 }
 0x531   : > { %v1578_v29 = vadd.f32 %v3422_v26, %v1577_v28 }
 0x533   : > { %v1665_v31 = vpack.c.bf16 %v1578_v29, %v1578_v29  ;;  %1659 = vmatmul.bf16.vlgmr.msrb.gmra.mxu3 %v4017_v17 }
 0x535   : > { %1673 = vmatpush.bf16.xpose.msra.mxu0 %v1665_v31 }
 0x538   : > { %v1579_v34 = vpop.f32.mrf.mxu2 }
 0x539   : > { %v3425_v34 = vld [vmem:[%s4153_s4 + $0x3] ss:$0 sm:$0xff] }
 0x53c   : > { %1674 = vmatmul.bf16.vlgmr.msra.gmra.mxu0 %v1664_v33 }
 0x53d   : > { %1862 = vmatpush.bf16.msrb.mxu0 %v3265_v61 }
 0x541   : > { %1863 = vmatpush.bf16.msrb.mxu0 %v3264_v62 }
 0x545   : > { %1864 = vmatpush.bf16.msrb.mxu0 %v3263_v0 }
 0x549   : > { %1865 = vmatpush.bf16.msrb.mxu0 %v3262_v2  ;;  %v3288_v2 = vld [vmem:[#allocation10 + $0xf0] sm:$0xff] }
 0x54d   : > { %1866 = vmatpush.bf16.msrb.mxu0 %v3261_v4  ;;  %v3286_v4 = vld [vmem:[#allocation10 + $0xe0] sm:$0xff] }
 0x551   : > { %1867 = vmatpush.bf16.msrb.mxu0 %v3260_v6  ;;  %v3284_v6 = vld [vmem:[#allocation10 + $0xd0] sm:$0xff] }
 0x555   : > { %1868 = vmatpush.bf16.msrb.mxu0 %v3259_v8  ;;  %v3283_v8 = vld [vmem:[#allocation10 + $0xc8] sm:$0xff] }
 0x559   : > { %1869 = vmatpush.bf16.msrb.mxu0 %v3258_v11 }
 0x55c   : > { %1870 = vmatmul.bf16.vlgmr.msrb.gmra.mxu0 %v4017_v17 }
 0x5a6   : > { %v4061_v37 = vpop.f32.mrf.mxu3 }
 0x5a7   : > { %v1412_v41 = vadd.f32 %v4043_v30, %v4061_v37  ;;  %v3274_v30 = vld [vmem:[#allocation8 + $0xc0] sm:$0xff] }
 0x5ae   : > { %v1352_v40 = vpop.f32.mrf.mxu3 }
 0x5b6   : > { %v1660_v55 = vpop.f32.mrf.mxu3 }
 0x5b7   : > { %v1661_v56 = vadd.f32 %v3423_v54, %v1660_v55 }
 0x5b9   : > { %v1675_v44 = vpop.f32.mrf.mxu0  ;;  %v1692_v57 = vpack.c.bf16 %v1661_v56, %v1661_v56 }
 0x5ba   : > { %v1679_v45 = vmul.f32 0.35355338, %v1675_v44  ;;  %v3281_v44 = vld [vmem:[#allocation8 + $0xf8] sm:$0xff] }
 0x5bb   : > { %v1697_v59 = vsel %vm944_vm1, %v1692_v57, 0  ;;  %2028 = vmatpush.bf16.msra.mxu3 %v3281_v44  ;;  %v3302_v44 = vld [vmem:[#allocation13 + $0x20] sm:$0xff] }
 0x5bc   : > { %v1680_v47 = vsel %vm927_vm0, %v1679_v45, -inf  ;;  %1706 = vmatpush.bf16.msrb.mxu1 %v1697_v59 }
 0x5bd   : > { %1681 = vmax.xlane.f32.xlu2 %v1680_v47 }
 0x5be   : > { %v1662_v60 = vpop.f32.mrf.mxu3 }
 0x5bf   : > { %v3426_v60 = vld [vmem:[%s4155_s6 + $0x3] ss:$0 sm:$0xff] }
 0x5c0   : > { %1945 = vmatpush.bf16.msra.mxu1 %v3273_v58 }
 0x5c1   : > { %v1677_v48 = vpop.f32.mrf.mxu0 }
 0x5c2   : > { %v3278_v48 = vld [vmem:[#allocation8 + $0xe0] sm:$0xff] }
 0x5c4   : > { %1946 = vmatpush.bf16.msra.mxu1 %v3272_v63 }
 0x5c8   : > { %1947 = vmatpush.bf16.msra.mxu1 %v3271_v1 }
 0x5cc   : > { %1948 = vmatpush.bf16.msra.mxu1 %v3270_v3  ;;  %v3287_v3 = vld [vmem:[#allocation10 + $0xe8] sm:$0xff] }
 0x5d0   : > { %1949 = vmatpush.bf16.msra.mxu1 %v3269_v5  ;;  %v3285_v5 = vld [vmem:[#allocation10 + $0xd8] sm:$0xff] }
 0x5d4   : > { %1950 = vmatpush.bf16.msra.mxu1 %v3268_v7 }
 0x5d8   : > { %1951 = vmatpush.bf16.msra.mxu1 %v3267_v9 }
 0x5d9   : > { %v1871_v26 = vpop.f32.mrf.mxu0 }
 0x5da   : > { %v1872_v38 = vadd.f32 %v3425_v34, %v1871_v26  ;;  %v3296_v26 = vld [vmem:[#allocation11 + $0x30] sm:$0xff] }
 0x5dc   : > { %1952 = vmatpush.bf16.msra.mxu1 %v3266_v10  ;;  %v2041_v39 = vpack.c.bf16 %v1872_v38, %v1872_v38 }
 0x5e1   : > { %v1873_v27 = vpop.f32.mrf.mxu0 }
 0x5e2   : > { %v3295_v27 = vld [vmem:[#allocation11 + $0x28] sm:$0xff] }
 0x630   : > { %v1682_v49 = vpop.xlane.xlu2 %1681 }
 0x631   : > { %v1683_v50 = vsub.f32 %v1679_v45, %v1682_v49  ;;  %v3280_v45 = vld [vmem:[#allocation8 + $0xf0] sm:$0xff]  ;;  %v3277_v49 = vld [vmem:[#allocation8 + $0xd8] sm:$0xff] }
 0x632   : > { %2029 = vmatpush.bf16.msra.mxu3 %v3280_v45 }
 0x633   : > { %v1684_v51 = vmul.f32 1.442695, %v1683_v50  ;;  %v3276_v50 = vld [vmem:[#allocation8 + $0xd0] sm:$0xff] }
 0x635   : > { %3442 = vpow2.f32 %v1684_v51  ;;  %v3275_v51 = vld [vmem:[#allocation8 + $0xc8] sm:$0xff] }
 0x636   : > { %2030 = vmatpush.bf16.msra.mxu3 %v3279_v46 }
 0x63a   : > { %2031 = vmatpush.bf16.msra.mxu3 %v3278_v48 }
 0x63b   : > { %v3443_v52 = vpop.eup %3442 }
 0x63c   : > { %v1686_v53 = vsel %vm927_vm0, %v3443_v52, 0.0 }
 0x63d   : > { %1687 = vadd.xlane.f32.xlu2 %v1686_v53 }
 0x63e   : > { %2032 = vmatpush.bf16.msra.mxu3 %v3277_v49 }
 0x642   : > { %2033 = vmatpush.bf16.msra.mxu3 %v3276_v50  ;;  %v3300_v50 = vld [vmem:[#allocation13 + $0x10] sm:$0xff] }
 0x646   : > { %2034 = vmatpush.bf16.msra.mxu3 %v3275_v51 }
 0x64a   : > { %2035 = vmatpush.bf16.msra.mxu3 %v3274_v30  ;;  %v3428_v30 = vld [vmem:[%s4158_s9] ss:$0 sm:$0xff] }
 0x64d   : > { %2036 = vmatmul.bf16.vlgmr.msra.gmra.mxu3 %v4017_v17 }
 0x6b0   : > { %v1688_v14 = vpop.xlane.xlu2 %1687 }
 0x6b1   : > { %3444 = vrcp.f32 %v1688_v14 }
 0x6b7   : > { %v3445_v19 = vpop.eup %3444 }
 0x6b8   : > { %v1690_v20 = vmul.f32 %v3445_v19, %v3443_v52 }
 0x6ba   : > { %v1691_v21 = vpack.c.bf16 %v1690_v20, %v1690_v20 }
 0x6bc   : > { %2929 = vmatmul.msk.bf16.vlgmr.msrb.gmra.mxu1 %vm927_vm0, %v1691_v21 }
 0x6cc   : > { %1953 = vmatmul.bf16.vlgmr.msra.gmra.mxu1 %v4017_v17  ;;  %v3289_v17 = vld [vmem:[#allocation10 + $0xf8] sm:$0xff] }
 0x6cd   : > { %2155 = vmatpush.bf16.msrb.mxu1 %v3289_v17 }
 0x6d0   : > { %v2037_v61 = vpop.f32.mrf.mxu3 }
 0x6d1   : > { %v2038_v62 = vadd.f32 %v3426_v60, %v2037_v61  ;;  %2156 = vmatpush.bf16.msrb.mxu1 %v3288_v2  ;;  %v3298_v60 = vld [vmem:[#allocation13] sm:$0xff]  ;;  %v3430_v61 = vld [vmem:[%s4161_s12] ss:$0 sm:$0xff] }
 0x6d2   : > { %v3431_v2 = vld [vmem:[%s4197_s30] ss:$0 sm:$0xff]  ;;  %s2421_s30 = sshll.u32 %s2417_s11, 4  ;;  %s2422_s30 = int_to_ptr.hbm [resolvable:$true] %s2421_s30 }
 0x6d3   : > { %v2069_v63 = vpack.c.bf16 %v2038_v62, %v2038_v62  ;;  %s3678_s3 = sshra.s32 %s2422_s30, 4  ;;  %s3679_s3 = int_to_ptr.hbm [resolvable:$true] %s3678_s3 }
 0x6d4   : > { %s3680_s16 = scalar_lea.hbm %s3679_s3, 8  ;;  %p3685_p12 = scmp.lt.s32.totalorder %s3679_s3, %s4200_s7 }
 0x6d5   : > { %v2074_v0 = vsel %vm944_vm1, %v2069_v63, 0  ;;  %2157 = vmatpush.bf16.msrb.mxu1 %v3287_v3  ;;  %p3681_p1 = scmp.ne.s32.totalorder %s3679_s3, %s3680_s16  ;;  %p3686_p7 = scmp.lt.s32.totalorder %s3684_s21, %s3680_s16 }
 0x6d6   : > { %2083 = vmatpush.bf16.msra.mxu0 %v2074_v0 }
 0x6d7   : > { %p3682_p3 = pnand %p3681_p1, %p3957_p4  ;;  %p3687_p8 = por %p3686_p7, %p3685_p12 }
 0x6d8   : > { %v2039_v1 = vpop.f32.mrf.mxu3 }
 0x6d9   : > { %2158 = vmatpush.bf16.msrb.mxu1 %v3286_v4  ;;  %p3683_p5 = pneg %p3682_p3 }
 0x6db   : > { %p3688_p9 = pnand %p3687_p8, %p3683_p5 }
 0x6dd   : > { %2159 = vmatpush.bf16.msrb.mxu1 %v3285_v5 }
 0x6e1   : > { %2160 = vmatpush.bf16.msrb.mxu1 %v3284_v6 }
 0x6e5   : > { %2161 = vmatpush.bf16.msrb.mxu1 %v3283_v8 }
 0x6e9   : > { %2162 = vmatpush.bf16.msrb.mxu1 %v3282_v12 }
 0x739   : > { %v1708_v28 = vpop.f32.mrf.mxu1 }
 0x73a   : > { %v1712_v29 = vpack.c.bf16 %v1708_v28, %v1708_v28  ;;  %v3294_v28 = vld [vmem:[#allocation11 + $0x20] sm:$0xff] }
 0x73c   : > { %1786 = vmatmul.bf16.vlgmr.msra.gmra.mxu2 %v1712_v29  ;;  %v3293_v29 = vld [vmem:[#allocation11 + $0x18] sm:$0xff] }
 0x741   : > { %v1710_v31 = vpop.f32.mrf.mxu1 }
 0x742   : > { %v3292_v31 = vld [vmem:[#allocation11 + $0x10] sm:$0xff] }
 0x749   : > { %v1954_v33 = vpop.f32.mrf.mxu1 }
 0x74a   : > { %v1955_v35 = vadd.f32 %v3424_v32, %v1954_v33  ;;  %v3291_v32 = vld [vmem:[#allocation11 + $0x8] sm:$0xff]  ;;  %v3290_v33 = vld [vmem:[#allocation11] sm:$0xff] }
 0x74c   : > { %v2042_v36 = vpack.c.bf16 %v1955_v35, %v1955_v35 }
 0x74e   : > { %2050 = vmatpush.bf16.xpose.msrb.mxu2 %v2042_v36 }
 0x751   : > { %v1956_v40 = vpop.f32.mrf.mxu1 }
 0x755   : > { %2051 = vmatmul.bf16.vlgmr.msrb.gmra.mxu2 %v2041_v39  ;;  %v3305_v39 = vld [vmem:[#allocation13 + $0x38] sm:$0xff] }
 0x756   : > { %2276 = vmatpush.bf16.msra.mxu2 %v3297_v25  ;;  %2359 = vmatpush.bf16.msrb.mxu3 %v3305_v39 }
 0x75a   : > { %2277 = vmatpush.bf16.msra.mxu2 %v3296_v26 }
 0x75e   : > { %2278 = vmatpush.bf16.msra.mxu2 %v3295_v27  ;;  %v3433_v27 = vld [vmem:[%s4201_s23] ss:$0 sm:$0xff] }
 0x762   : > { %2279 = vmatpush.bf16.msra.mxu2 %v3294_v28 }
 0x766   : > { %2280 = vmatpush.bf16.msra.mxu2 %v3293_v29 }
 0x76a   : > { %2281 = vmatpush.bf16.msra.mxu2 %v3292_v31 }
 0x76e   : > { %2282 = vmatpush.bf16.msra.mxu2 %v3291_v32 }
 0x772   : > { %2283 = vmatpush.bf16.msra.mxu2 %v3290_v33 }
 0x7bf   : > { %v1787_v42 = vpop.f32.mrf.mxu2 }
 0x7c0   : > { %v4081_v43 = vadd.f32 %v1787_v42, %v1412_v41  ;;  %v3304_v41 = vld [vmem:[#allocation13 + $0x30] sm:$0xff] }
 0x7c1   : > { %2360 = vmatpush.bf16.msrb.mxu3 %v3304_v41 }
 0x7c7   : > { %v1789_v47 = vpop.f32.mrf.mxu2 }
 0x7c8   : > { %v3301_v47 = vld [vmem:[#allocation13 + $0x18] sm:$0xff] }
 0x7d8   : > { %v2052_v52 = vpop.f32.mrf.mxu2 }
 0x7d9   : > { %v2056_v53 = vmul.f32 0.35355338, %v2052_v52 }
 0x7db   : > { %v2057_v37 = vsel %vm927_vm0, %v2056_v53, -inf }
 0x7dc   : > { %2058 = vmax.xlane.f32.xlu0 %v2057_v37 }
 0x7e0   : > { %v2054_v54 = vpop.f32.mrf.mxu2 }
 0x84f   : > { %v2059_v55 = vpop.xlane.xlu0 %2058 }
 0x850   : > { %v2060_v56 = vsub.f32 %v2056_v53, %v2059_v55  ;;  %v3429_v55 = vld [vmem:[%s4159_s10] ss:$0 sm:$0xff] }
 0x852   : > { %v2061_v57 = vmul.f32 1.442695, %v2060_v56 }
 0x854   : > { %3446 = vpow2.f32 %v2061_v57 }
 0x85a   : > { %v3447_v58 = vpop.eup %3446 }
 0x85b   : > { %v2063_v59 = vsel %vm927_vm0, %v3447_v58, 0.0 }
 0x85c   : > { %2064 = vadd.xlane.f32.xlu1 %v2063_v59  ;;  %v3299_v59 = vld [vmem:[#allocation13 + $0x8] sm:$0xff] }
 0x8cf   : > { %v2065_v7 = vpop.xlane.xlu1 %2064 }
 0x8d0   : > { %3448 = vrcp.f32 %v2065_v7 }
 0x8d6   : > { %v3449_v9 = vpop.eup %3448 }
 0x8d7   : > { %v2067_v10 = vmul.f32 %v3449_v9, %v3447_v58 }
 0x8d9   : > { %v2068_v11 = vpack.c.bf16 %v2067_v10, %v2067_v10 }
 0x8db   : > { %3061 = vmatmul.msk.bf16.vlgmr.msra.gmra.mxu0 %vm927_vm0, %v2068_v11 }
 0x958   : > { %v2085_v13 = vpop.f32.mrf.mxu0 }
 0x959   : > { %v2089_v14 = vpack.c.bf16 %v2085_v13, %v2085_v13 }
 0x95b   : > { %2163 = vmatmul.bf16.vlgmr.msrb.gmra.mxu1 %v2089_v14 }
 0x960   : > { %v2087_v15 = vpop.f32.mrf.mxu0 }
 0x9d8   : > { %v2164_v19 = vpop.f32.mrf.mxu1 }
 0x9d9   : > { %v2168_v20 = vadd.f32 %v2164_v19, %v4081_v43  ;;  %v3303_v43 = vld [vmem:[#allocation13 + $0x28] sm:$0xff] }
 0x9da   : > { %2361 = vmatpush.bf16.msrb.mxu3 %v3303_v43 }
 0x9db   : > { %v2173_v21 = vadd.f32 %v3427_v18, %v2168_v20 }
 0x9dd   : > { %v2174_v22 = vadd.f32 %v2173_v21, %v4013_v16 }
 0x9de   : > { %2362 = vmatpush.bf16.msrb.mxu3 %v3302_v44 }
 0x9df   : > { %2177 = vadd.xlane.f32.xlu2 %v2174_v22  ;;  %v2180_v23 = vmul.f32 %v2174_v22, %v2174_v22 }
 0x9e0   : > { %v2166_v24 = vpop.f32.mrf.mxu1 }
 0x9e1   : > { %2181 = vadd.xlane.f32.xlu0 %v2180_v23  ;;  %v3432_v24 = vld [vmem:[%s4198_s29] ss:$0 sm:$0xff] }
 0x9e2   : > { %2363 = vmatpush.bf16.msrb.mxu3 %v3301_v47 }
 0x9e6   : > { %2364 = vmatpush.bf16.msrb.mxu3 %v3300_v50 }
 0x9ea   : > { %2365 = vmatpush.bf16.msrb.mxu3 %v3299_v59 }
 0x9ee   : > { %2366 = vmatpush.bf16.msrb.mxu3 %v3298_v60 }
 0xa52   : > { %v2178_v16 = vpop.xlane.xlu2 %2177 }
 0xa53   : > { %v2179_v34 = vmul.f32 0.03125, %v2178_v16 }
 0xa54   : > { %v2182_v35 = vpop.xlane.xlu0 %2181 }
 0xa55   : > { %v2184_v36 = vmul.f32 %v2179_v34, %v2179_v34  ;;  %v2183_v38 = vmul.f32 0.03125, %v2182_v35  ;;  %v2186_v53 = vsub.f32 %v2174_v22, %v2179_v34 }
 0xa57   : > { %v2185_v40 = vsub.f32 %v2183_v38, %v2184_v36 }
 0xa59   : > { %v2187_v42 = vadd.f32 1e-05, %v2185_v40 }
 0xa5b   : > { %3450 = vrsqrt.f32 %v2187_v42  ;;  %vm2194_vm3 = vweird.f32 %v2187_v42 }
 0xa61   : > { %v3451_v45 = vpop.eup %3450 }
 0xa62   : > { %v2189_v46 = vmul.f32 %v3451_v45, %v2187_v42  ;;  %vm2195_vm2 = vweird.f32 %v3451_v45 }
 0xa63   : > { %vm2196_vm4 = vmor %vm2194_vm3, %vm2195_vm2 }
 0xa64   : > { %v2190_v48 = vmul.f32 %v3451_v45, %v2189_v46 }
 0xa66   : > { %v2191_v49 = vmul.f32 0.5, %v2190_v48 }
 0xa68   : > { %v2192_v51 = vsub.f32 1.5, %v2191_v49 }
 0xa6a   : > { %v2193_v52 = vmul.f32 %v3451_v45, %v2192_v51 }
 0xa6c   : > { %v2197_v37 = vsel %vm2196_vm4, %v3451_v45, %v2193_v52 }
 0xa6d   : > { %v2198_v54 = vmul.f32 %v2197_v37, %v2186_v53 }
 0xa6f   : > { %v2202_v56 = vmul.f32 %v3428_v30, %v2198_v54 }
 0xa71   : > { %v2206_v57 = vadd.f32 %v3429_v55, %v2202_v56 }
 0xa73   : > { %v2207_v58 = vpack.c.bf16 %v2206_v57, %v2206_v57 }
 0xa75   : > { %2284 = vmatmul.bf16.vlgmr.msra.gmra.mxu2 %v2207_v58 }
 0xaf8   : > { %v2285_v62 = vpop.f32.mrf.mxu2 }
 0xaf9   : > { %v2286_v63 = vadd.f32 %v3430_v61, %v2285_v62 }
 0xafb   : > { %v2289_v0 = vmax.f32 %v2286_v63, 0.0 }
 0xafd   : > { %v2290_v1 = vpack.c.bf16 %v2289_v0, %v2289_v0 }
 0xaff   : > { %2367 = vmatmul.bf16.vlgmr.msrb.gmra.mxu3 %v2290_v1 }
 0xb00   : > { %v2287_v17 = vpop.f32.mrf.mxu2 }
 0xb82   : > { %v2368_v3 = vpop.f32.mrf.mxu3 }
 0xb83   : > { %v2369_v4 = vadd.f32 %v3431_v2, %v2368_v3 }
 0xb85   : > { %v2372_v5 = vadd.f32 %v2369_v4, %v2206_v57 }
 0xb87   : > { %2375 = vadd.xlane.f32.xlu1 %v2372_v5  ;;  %v2378_v6 = vmul.f32 %v2372_v5, %v2372_v5 }
 0xb89   : > { %2379 = vadd.xlane.f32.xlu2 %v2378_v6 }
 0xb8a   : > { %v2370_v7 = vpop.f32.mrf.mxu3 }
 0xbfa   : > { %v2376_v8 = vpop.xlane.xlu1 %2375 }
 0xbfb   : > { %v2377_v9 = vmul.f32 0.03125, %v2376_v8 }
 0xbfc   : > { %v2380_v10 = vpop.xlane.xlu2 %2379 }
 0xbfd   : > { %v2382_v11 = vmul.f32 %v2377_v9, %v2377_v9  ;;  %v2381_v12 = vmul.f32 0.03125, %v2380_v10  ;;  %v2384_v23 = vsub.f32 %v2372_v5, %v2377_v9 }
 0xbff   : > { %v2383_v13 = vsub.f32 %v2381_v12, %v2382_v11 }
 0xc01   : > { %v2385_v14 = vadd.f32 1e-05, %v2383_v13 }
 0xc03   : > { %3452 = vrsqrt.f32 %v2385_v14  ;;  %vm2392_vm6 = vweird.f32 %v2385_v14 }
 0xc09   : > { %v3453_v15 = vpop.eup %3452 }
 0xc0a   : > { %v2387_v18 = vmul.f32 %v3453_v15, %v2385_v14  ;;  %vm2393_vm5 = vweird.f32 %v3453_v15 }
 0xc0b   : > { %vm2394_vm7 = vmor %vm2392_vm6, %vm2393_vm5 }
 0xc0c   : > { %v2388_v19 = vmul.f32 %v3453_v15, %v2387_v18 }
 0xc0e   : > { %v2389_v20 = vmul.f32 0.5, %v2388_v19 }
 0xc10   : > { %v2390_v21 = vsub.f32 1.5, %v2389_v20 }
 0xc12   : > { %v2391_v22 = vmul.f32 %v3453_v15, %v2390_v21 }
 0xc14   : > { %v2395_v25 = vsel %vm2394_vm7, %v3453_v15, %v2391_v22 }
 0xc15   : > { %v2396_v26 = vmul.f32 %v2395_v25, %v2384_v23 }
 0xc17   : > { %v2400_v28 = vmul.f32 %v3432_v24, %v2396_v26 }
 0xc19   : > { %v2404_v29 = vadd.f32 %v3433_v27, %v2400_v28 }
 0xc1b   : > { %2405 = vst [vmem:[%s664_s18] sm:$0xff] %v2404_v29 }
 0xc1c   : > { %3691 = shalt.err (!%p3688_p9)
}
 0xc1d   : > { %3332 = dma.vmem_to_hbm [thread:$0]  (%p3957_p4), %s2420_s14, 128, %s2422_s30, %s2407_s2  }
 0xc1e PF: > { %s2433_s15 = sand.u32 1, %s3730_s24   ;;  %p4202_p10 = scmp.ge.s32.totalorder %s3742_s27, 2 }
 0xc1f   : > { %s2434_s11 = scalar_lea.sflag [#allocation4], %s2433_s15 }
 0xc20   : > { %p3358_p13 = pnand %p4202_p10, %p3961_p6 }
 0xc22   : > { %p3359_p11 = pneg %p3358_p13 }
 0xc24   : > { %3725 = dma.done.wait (%p3359_p11), %s2434_s11, 128  }
 0xc25   : > { %3727 = vsyncadd (%p3359_p11), %s2434_s11, 4294967168  ;;  %s4203_s13 = sld [smem:[#allocation20_spill]]  ;;  %p33_p0 = scmp.ge.s32.totalorder %s3931_s20, 4  }
 0xc26   : > { %s4204_s26 = sld [smem:[#allocation21_spill]]  ;;  %s4205_s24 = smov %s3734_s25 }
 0xc27   : > { %s4207_s27 = smov %s3931_s20  ;;  %35 = sbr.rel (!%p33_p0) target bundleno = 20 (0x14), region = 178 }
 0xc2b   : > { %s4206_s25 = smov %s4203_s13 }
 0xc2c   :  { %2440 = vsyncpa [#allocation3], 1 }
 0xc2d   :  { %2442 = vsyncpa [#allocation3 + $0x1], 1 }
 0xc2e   :  { %2443 = vsyncpa [#allocation6], 1 }
 0xc2f   :  { %2444 = vsyncpa [#allocation9], 1 }
 0xc30   :  { %2445 = vsyncpa [#allocation12], 1 }
 0xc31   :  { %2446 = vsyncpa [#allocation4], 1 }
 0xc32   :  { %2448 = vsyncpa [#allocation4 + $0x1], 1 }

</bundles_post_ra>
